<compile_context>
chip_gen: v7x
topology: tpu7x:2x2x1
jax: 0.10.0
libtpu: 0.0.40
codegen_flags: <defaults>
</compile_context>

<pallas_src>
import functools

import jax
import jax.numpy as jnp
from jax.experimental import pallas as pl
from jax.experimental.pallas import tpu as pltpu


# --------------------------------------------------------------------------
# Fused Pallas kernel: all LSTM layers + output Linear
# --------------------------------------------------------------------------
def fused_lstm_kernel(*refs, num_layers, hidden_size, seq_len, batch):
    """refs = [x (S*B, I),
               (w_ih (in,4H), w_hh (H,4H), b (1,4H)) * num_layers,
               w_lin (H, C), b_lin (1, C),
               out (L*B, C),
               seq_sc (S*B, H)  -- scratch, only if num_layers > 1]
    """
    idx = 0
    x_ref = refs[idx]; idx += 1
    layer_refs = []
    for _ in range(num_layers):
        layer_refs.append(refs[idx:idx + 3]); idx += 3
    w_lin_ref = refs[idx]; idx += 1
    b_lin_ref = refs[idx]; idx += 1
    out_ref = refs[idx]; idx += 1
    seq_sc = refs[idx] if num_layers > 1 else None

    S, B, H = seq_len, batch, hidden_size

    h_finals = []
    for layer, (w_ih_ref, w_hh_ref, b_ref) in enumerate(layer_refs):
        is_last = (layer == num_layers - 1)

        # Layer input: original x for layer 0, previous layer's hidden
        # sequence (resident in VMEM scratch) afterwards.
        layer_in = x_ref[...] if layer == 0 else seq_sc[...]     # (S*B, in)

        # Hoisted input projection: one big MXU matmul per layer, bias folded
        # in, off the recurrent critical path.
        gates_x = (
            jnp.dot(layer_in, w_ih_ref[...],
                    preferred_element_type=jnp.float32)
            + b_ref[...]
        )                                                         # (S*B, 4H)

        w_hh = w_hh_ref[...]        # hoisted invariant load

        h = jnp.zeros((B, H), jnp.float32)
        c = jnp.zeros((B, H), jnp.float32)

        # Fully unrolled recurrence (S is static and small).
        for t in range(S):
            gates = gates_x[t * B:(t + 1) * B, :] + jnp.dot(
                h, w_hh, preferred_element_type=jnp.float32)      # (B, 4H)
            # Full-vreg activations: 2 EUP passes instead of 4 sliced ones.
            sig = jax.nn.sigmoid(gates)
            tnh = jnp.tanh(gates)
            i_g = sig[:, 0 * H:1 * H]
            f_g = sig[:, 1 * H:2 * H]
            g_g = tnh[:, 2 * H:3 * H]
            o_g = sig[:, 3 * H:4 * H]
            c = f_g * c + i_g * g_g
            h = o_g * jnp.tanh(c)
            if not is_last:
                # Feed next layer; stays in VMEM (never round-trips HBM).
                seq_sc[t * B:(t + 1) * B, :] = h
        h_finals.append(h)

    # h_out.view(-1, hidden_size): (L, B, H) -> (L*B, H), then Linear head.
    h_out = jnp.concatenate(h_finals, axis=0)                     # (L*B, H)
    out_ref[...] = (
        jnp.dot(h_out, w_lin_ref[...], preferred_element_type=jnp.float32)
        + b_lin_ref[...]
    )


# --------------------------------------------------------------------------
# Wrapper
# --------------------------------------------------------------------------
_VMEM = pl.BlockSpec(memory_space=pltpu.MemorySpace.VMEM)


def lstm_model_forward(x_bsi, params):
    """Mirrors LSTM.forward: x (B, S, I) -> (num_layers * B, num_classes)."""
    B, S, I = x_bsi.shape
    lstm_params = params["lstm"]
    L = len(lstm_params)
    H = lstm_params[0][1].shape[0]
    C = params["w_lin_t"].shape[1]

    # (B, S, I) -> (S, B, I) -> (S*B, I): row t*B + b holds x[b, t].
    x_flat = jnp.transpose(x_bsi, (1, 0, 2)).reshape(S * B, I)

    flat_inputs = [x_flat]
    for (w_ih_t, w_hh_t, b) in lstm_params:
        flat_inputs += [w_ih_t, w_hh_t, b]
    flat_inputs += [params["w_lin_t"], params["b_lin"]]

    kernel = functools.partial(
        fused_lstm_kernel, num_layers=L, hidden_size=H, seq_len=S, batch=B)

    scratch = [pltpu.VMEM((S * B, H), jnp.float32)] if L > 1 else []

    return pl.pallas_call(
        kernel,
        out_shape=jax.ShapeDtypeStruct((L * B, C), jnp.float32),
        in_specs=[_VMEM] * len(flat_inputs),
        out_specs=_VMEM,
        scratch_shapes=scratch,
    )(*flat_inputs)


# --------------------------------------------------------------------------
# Pure-JAX reference (same math) for a correctness check
# --------------------------------------------------------------------------
def lstm_model_ref(x_bsi, params):
    B = x_bsi.shape[0]
    layer_in = jnp.transpose(x_bsi, (1, 0, 2))
    h_finals = []
    for (w_ih_t, w_hh_t, b) in params["lstm"]:
        H = w_hh_t.shape[0]
        h = jnp.zeros((B, H), jnp.float32)
        c = jnp.zeros((B, H), jnp.float32)
        outs = []
        for t in range(layer_in.shape[0]):
            gates = layer_in[t] @ w_ih_t + h @ w_hh_t + b
            i_g = jax.nn.sigmoid(gates[:, :H])
            f_g = jax.nn.sigmoid(gates[:, H:2 * H])
            g_g = jnp.tanh(gates[:, 2 * H:3 * H])
            o_g = jax.nn.sigmoid(gates[:, 3 * H:])
            c = f_g * c + i_g * g_g
            h = o_g * jnp.tanh(c)
            outs.append(h)
        layer_in = jnp.stack(outs, axis=0)
        h_finals.append(h)
    h_out = jnp.concatenate(h_finals, axis=0)
    return h_out @ params["w_lin_t"] + params["b_lin"]


# --------------------------------------------------------------------------
# Deterministic parameter init (PyTorch-style uniform(-1/sqrt(H), 1/sqrt(H)))
# --------------------------------------------------------------------------
def init_params(key, input_size, hidden_size, num_layers):
    bound = 1.0 / jnp.sqrt(jnp.float32(hidden_size))
    params = {"lstm": []}
    for layer in range(num_layers):
        in_sz = input_size if layer == 0 else hidden_size
        key, k1, k2, k3, k4 = jax.random.split(key, 5)
        w_ih_t = jax.random.uniform(k1, (in_sz, 4 * hidden_size),
                                    jnp.float32, -bound, bound)
        w_hh_t = jax.random.uniform(k2, (hidden_size, 4 * hidden_size),
                                    jnp.float32, -bound, bound)
        b_ih = jax.random.uniform(k3, (4 * hidden_size,), jnp.float32,
                                  -bound, bound)
        b_hh = jax.random.uniform(k4, (4 * hidden_size,), jnp.float32,
                                  -bound, bound)
        params["lstm"].append((w_ih_t, w_hh_t, (b_ih + b_hh)[None, :]))
    key, k5, k6 = jax.random.split(key, 3)
    lin_bound = 1.0 / jnp.sqrt(jnp.float32(hidden_size))
    params["w_lin_t"] = jax.random.uniform(
        k5, (hidden_size, input_size), jnp.float32, -lin_bound, lin_bound)
    params["b_lin"] = jax.random.uniform(
        k6, (1, input_size), jnp.float32, -lin_bound, lin_bound)
    return params


# --------------------------------------------------------------------------
if __name__ == "__main__":
    hparam = {"NUM_LAYERS": 2, "XZ_RATIO": 4, "SEQ_LEN": 8}
    input_size = 8
    hidden_size = input_size * hparam["XZ_RATIO"]     # 32
    num_layers = hparam["NUM_LAYERS"]
    seq_len = hparam["SEQ_LEN"]
    batch = 2

    key = jax.random.PRNGKey(0)
    key, kx = jax.random.split(key)
    x = jax.random.normal(kx, (batch, seq_len, input_size), jnp.float32)

    params = init_params(key, input_size, hidden_size, num_layers)

    out = lstm_model_forward(x, params)
    out = jax.block_until_ready(out)

    ref = lstm_model_ref(x, params)
    assert out.shape == (num_layers * batch, input_size), out.shape
    assert jnp.allclose(out, ref, rtol=2e-2, atol=2e-2), "mismatch vs reference"

    print("KERNEL_OK")
</pallas_src>

<mosaic_0001>
module attributes {stable_mosaic.version = 11 : i64} {
  func.func @fused_lstm_kernel(%arg0: memref<16x8xf32, #tpu.memory_space<vmem>>, %arg1: memref<8x128xf32, #tpu.memory_space<vmem>>, %arg2: memref<32x128xf32, #tpu.memory_space<vmem>>, %arg3: memref<1x128xf32, #tpu.memory_space<vmem>>, %arg4: memref<32x128xf32, #tpu.memory_space<vmem>>, %arg5: memref<32x128xf32, #tpu.memory_space<vmem>>, %arg6: memref<1x128xf32, #tpu.memory_space<vmem>>, %arg7: memref<32x8xf32, #tpu.memory_space<vmem>>, %arg8: memref<1x8xf32, #tpu.memory_space<vmem>>, %arg9: memref<4x8xf32, #tpu.memory_space<vmem>>, %arg10: memref<16x32xf32, #tpu.memory_space<vmem>>) attributes {dimension_semantics = [], scalar_prefetch = 0 : i64, scratch_operands = 1 : i64, tpu.core_type = #tpu.core_type<tc>} {
    %c0 = arith.constant 0 : index
    %c0_0 = arith.constant 0 : index
    %0 = vector.load %arg0[%c0, %c0_0] : memref<16x8xf32, #tpu.memory_space<vmem>>, vector<16x8xf32>
    %c0_1 = arith.constant 0 : index
    %c0_2 = arith.constant 0 : index
    %1 = vector.load %arg1[%c0_1, %c0_2] : memref<8x128xf32, #tpu.memory_space<vmem>>, vector<8x128xf32>
    %cst = arith.constant dense<0.000000e+00> : vector<16x128xf32>
    %2 = tpu.matmul %0, %1, %cst {dimension_numbers = #tpu.dot_dimension_numbers<[1], [0], [0], [1], [0, 0, 1, 1], [], []>} : vector<16x8xf32>, vector<8x128xf32>, vector<16x128xf32> -> vector<16x128xf32>
    %c0_3 = arith.constant 0 : index
    %c0_4 = arith.constant 0 : index
    %3 = vector.load %arg3[%c0_3, %c0_4] : memref<1x128xf32, #tpu.memory_space<vmem>>, vector<1x128xf32>
    %4 = vector.broadcast %3 : vector<1x128xf32> to vector<16x128xf32>
    %5 = arith.addf %2, %4 : vector<16x128xf32>
    %c0_5 = arith.constant 0 : index
    %c0_6 = arith.constant 0 : index
    %6 = vector.load %arg2[%c0_5, %c0_6] : memref<32x128xf32, #tpu.memory_space<vmem>>, vector<32x128xf32>
    %cst_7 = arith.constant 0.000000e+00 : f32
    %7 = vector.broadcast %cst_7 : f32 to vector<2x32xf32>
    %cst_8 = arith.constant 0.000000e+00 : f32
    %8 = vector.broadcast %cst_8 : f32 to vector<2x32xf32>
    %9 = vector.extract_strided_slice %5 {offsets = [0, 0], sizes = [2, 128], strides = [1, 1]} : vector<16x128xf32> to vector<2x128xf32>
    %cst_9 = arith.constant dense<0.000000e+00> : vector<2x128xf32>
    %10 = tpu.matmul %7, %6, %cst_9 {dimension_numbers = #tpu.dot_dimension_numbers<[1], [0], [0], [1], [0, 0, 1, 1], [], []>} : vector<2x32xf32>, vector<32x128xf32>, vector<2x128xf32> -> vector<2x128xf32>
    %11 = arith.addf %9, %10 : vector<2x128xf32>
    %12 = arith.negf %11 : vector<2x128xf32>
    %13 = math.exp %12 : vector<2x128xf32>
    %cst_10 = arith.constant 1.000000e+00 : f32
    %14 = vector.broadcast %cst_10 : f32 to vector<2x128xf32>
    %15 = arith.addf %14, %13 : vector<2x128xf32>
    %16 = arith.divf %14, %15 : vector<2x128xf32>
    %17 = math.tanh %11 : vector<2x128xf32>
    %18 = vector.extract_strided_slice %16 {offsets = [0, 0], sizes = [2, 32], strides = [1, 1]} : vector<2x128xf32> to vector<2x32xf32>
    %19 = vector.extract_strided_slice %16 {offsets = [0, 32], sizes = [2, 32], strides = [1, 1]} : vector<2x128xf32> to vector<2x32xf32>
    %20 = vector.extract_strided_slice %17 {offsets = [0, 64], sizes = [2, 32], strides = [1, 1]} : vector<2x128xf32> to vector<2x32xf32>
    %21 = vector.extract_strided_slice %16 {offsets = [0, 96], sizes = [2, 32], strides = [1, 1]} : vector<2x128xf32> to vector<2x32xf32>
    %22 = arith.mulf %19, %8 : vector<2x32xf32>
    %23 = arith.mulf %18, %20 : vector<2x32xf32>
    %24 = arith.addf %22, %23 : vector<2x32xf32>
    %25 = math.tanh %24 : vector<2x32xf32>
    %26 = arith.mulf %21, %25 : vector<2x32xf32>
    %c0_11 = arith.constant 0 : index
    %c0_12 = arith.constant 0 : index
    %27 = vector.load %arg10[%c0_11, %c0_12] : memref<16x32xf32, #tpu.memory_space<vmem>>, vector<2x32xf32>
    tpu.vector_store %arg10[%c0_11, %c0_12], %26 {strides = array<i32>} : memref<16x32xf32, #tpu.memory_space<vmem>>, vector<2x32xf32>,
    %28 = vector.extract_strided_slice %5 {offsets = [2, 0], sizes = [2, 128], strides = [1, 1]} : vector<16x128xf32> to vector<2x128xf32>
    %cst_13 = arith.constant dense<0.000000e+00> : vector<2x128xf32>
    %29 = tpu.matmul %26, %6, %cst_13 {dimension_numbers = #tpu.dot_dimension_numbers<[1], [0], [0], [1], [0, 0, 1, 1], [], []>} : vector<2x32xf32>, vector<32x128xf32>, vector<2x128xf32> -> vector<2x128xf32>
    %30 = arith.addf %28, %29 : vector<2x128xf32>
    %31 = arith.negf %30 : vector<2x128xf32>
    %32 = math.exp %31 : vector<2x128xf32>
    %cst_14 = arith.constant 1.000000e+00 : f32
    %33 = vector.broadcast %cst_14 : f32 to vector<2x128xf32>
    %34 = arith.addf %33, %32 : vector<2x128xf32>
    %35 = arith.divf %33, %34 : vector<2x128xf32>
    %36 = math.tanh %30 : vector<2x128xf32>
    %37 = vector.extract_strided_slice %35 {offsets = [0, 0], sizes = [2, 32], strides = [1, 1]} : vector<2x128xf32> to vector<2x32xf32>
    %38 = vector.extract_strided_slice %35 {offsets = [0, 32], sizes = [2, 32], strides = [1, 1]} : vector<2x128xf32> to vector<2x32xf32>
    %39 = vector.extract_strided_slice %36 {offsets = [0, 64], sizes = [2, 32], strides = [1, 1]} : vector<2x128xf32> to vector<2x32xf32>
    %40 = vector.extract_strided_slice %35 {offsets = [0, 96], sizes = [2, 32], strides = [1, 1]} : vector<2x128xf32> to vector<2x32xf32>
    %41 = arith.mulf %38, %24 : vector<2x32xf32>
    %42 = arith.mulf %37, %39 : vector<2x32xf32>
    %43 = arith.addf %41, %42 : vector<2x32xf32>
    %44 = math.tanh %43 : vector<2x32xf32>
    %45 = arith.mulf %40, %44 : vector<2x32xf32>
    %c2 = arith.constant 2 : index
    %c0_15 = arith.constant 0 : index
    %46 = vector.load %arg10[%c2, %c0_15] : memref<16x32xf32, #tpu.memory_space<vmem>>, vector<2x32xf32>
    tpu.vector_store %arg10[%c2, %c0_15], %45 {strides = array<i32>} : memref<16x32xf32, #tpu.memory_space<vmem>>, vector<2x32xf32>,
    %47 = vector.extract_strided_slice %5 {offsets = [4, 0], sizes = [2, 128], strides = [1, 1]} : vector<16x128xf32> to vector<2x128xf32>
    %cst_16 = arith.constant dense<0.000000e+00> : vector<2x128xf32>
    %48 = tpu.matmul %45, %6, %cst_16 {dimension_numbers = #tpu.dot_dimension_numbers<[1], [0], [0], [1], [0, 0, 1, 1], [], []>} : vector<2x32xf32>, vector<32x128xf32>, vector<2x128xf32> -> vector<2x128xf32>
    %49 = arith.addf %47, %48 : vector<2x128xf32>
    %50 = arith.negf %49 : vector<2x128xf32>
    %51 = math.exp %50 : vector<2x128xf32>
    %cst_17 = arith.constant 1.000000e+00 : f32
    %52 = vector.broadcast %cst_17 : f32 to vector<2x128xf32>
    %53 = arith.addf %52, %51 : vector<2x128xf32>
    %54 = arith.divf %52, %53 : vector<2x128xf32>
    %55 = math.tanh %49 : vector<2x128xf32>
    %56 = vector.extract_strided_slice %54 {offsets = [0, 0], sizes = [2, 32], strides = [1, 1]} : vector<2x128xf32> to vector<2x32xf32>
    %57 = vector.extract_strided_slice %54 {offsets = [0, 32], sizes = [2, 32], strides = [1, 1]} : vector<2x128xf32> to vector<2x32xf32>
    %58 = vector.extract_strided_slice %55 {offsets = [0, 64], sizes = [2, 32], strides = [1, 1]} : vector<2x128xf32> to vector<2x32xf32>
    %59 = vector.extract_strided_slice %54 {offsets = [0, 96], sizes = [2, 32], strides = [1, 1]} : vector<2x128xf32> to vector<2x32xf32>
    %60 = arith.mulf %57, %43 : vector<2x32xf32>
    %61 = arith.mulf %56, %58 : vector<2x32xf32>
    %62 = arith.addf %60, %61 : vector<2x32xf32>
    %63 = math.tanh %62 : vector<2x32xf32>
    %64 = arith.mulf %59, %63 : vector<2x32xf32>
    %c4 = arith.constant 4 : index
    %c0_18 = arith.constant 0 : index
    %65 = vector.load %arg10[%c4, %c0_18] : memref<16x32xf32, #tpu.memory_space<vmem>>, vector<2x32xf32>
    tpu.vector_store %arg10[%c4, %c0_18], %64 {strides = array<i32>} : memref<16x32xf32, #tpu.memory_space<vmem>>, vector<2x32xf32>,
    %66 = vector.extract_strided_slice %5 {offsets = [6, 0], sizes = [2, 128], strides = [1, 1]} : vector<16x128xf32> to vector<2x128xf32>
    %cst_19 = arith.constant dense<0.000000e+00> : vector<2x128xf32>
    %67 = tpu.matmul %64, %6, %cst_19 {dimension_numbers = #tpu.dot_dimension_numbers<[1], [0], [0], [1], [0, 0, 1, 1], [], []>} : vector<2x32xf32>, vector<32x128xf32>, vector<2x128xf32> -> vector<2x128xf32>
    %68 = arith.addf %66, %67 : vector<2x128xf32>
    %69 = arith.negf %68 : vector<2x128xf32>
    %70 = math.exp %69 : vector<2x128xf32>
    %cst_20 = arith.constant 1.000000e+00 : f32
    %71 = vector.broadcast %cst_20 : f32 to vector<2x128xf32>
    %72 = arith.addf %71, %70 : vector<2x128xf32>
    %73 = arith.divf %71, %72 : vector<2x128xf32>
    %74 = math.tanh %68 : vector<2x128xf32>
    %75 = vector.extract_strided_slice %73 {offsets = [0, 0], sizes = [2, 32], strides = [1, 1]} : vector<2x128xf32> to vector<2x32xf32>
    %76 = vector.extract_strided_slice %73 {offsets = [0, 32], sizes = [2, 32], strides = [1, 1]} : vector<2x128xf32> to vector<2x32xf32>
    %77 = vector.extract_strided_slice %74 {offsets = [0, 64], sizes = [2, 32], strides = [1, 1]} : vector<2x128xf32> to vector<2x32xf32>
    %78 = vector.extract_strided_slice %73 {offsets = [0, 96], sizes = [2, 32], strides = [1, 1]} : vector<2x128xf32> to vector<2x32xf32>
    %79 = arith.mulf %76, %62 : vector<2x32xf32>
    %80 = arith.mulf %75, %77 : vector<2x32xf32>
    %81 = arith.addf %79, %80 : vector<2x32xf32>
    %82 = math.tanh %81 : vector<2x32xf32>
    %83 = arith.mulf %78, %82 : vector<2x32xf32>
    %c6 = arith.constant 6 : index
    %c0_21 = arith.constant 0 : index
    %84 = vector.load %arg10[%c6, %c0_21] : memref<16x32xf32, #tpu.memory_space<vmem>>, vector<2x32xf32>
    tpu.vector_store %arg10[%c6, %c0_21], %83 {strides = array<i32>} : memref<16x32xf32, #tpu.memory_space<vmem>>, vector<2x32xf32>,
    %85 = vector.extract_strided_slice %5 {offsets = [8, 0], sizes = [2, 128], strides = [1, 1]} : vector<16x128xf32> to vector<2x128xf32>
    %cst_22 = arith.constant dense<0.000000e+00> : vector<2x128xf32>
    %86 = tpu.matmul %83, %6, %cst_22 {dimension_numbers = #tpu.dot_dimension_numbers<[1], [0], [0], [1], [0, 0, 1, 1], [], []>} : vector<2x32xf32>, vector<32x128xf32>, vector<2x128xf32> -> vector<2x128xf32>
    %87 = arith.addf %85, %86 : vector<2x128xf32>
    %88 = arith.negf %87 : vector<2x128xf32>
    %89 = math.exp %88 : vector<2x128xf32>
    %cst_23 = arith.constant 1.000000e+00 : f32
    %90 = vector.broadcast %cst_23 : f32 to vector<2x128xf32>
    %91 = arith.addf %90, %89 : vector<2x128xf32>
    %92 = arith.divf %90, %91 : vector<2x128xf32>
    %93 = math.tanh %87 : vector<2x128xf32>
    %94 = vector.extract_strided_slice %92 {offsets = [0, 0], sizes = [2, 32], strides = [1, 1]} : vector<2x128xf32> to vector<2x32xf32>
    %95 = vector.extract_strided_slice %92 {offsets = [0, 32], sizes = [2, 32], strides = [1, 1]} : vector<2x128xf32> to vector<2x32xf32>
    %96 = vector.extract_strided_slice %93 {offsets = [0, 64], sizes = [2, 32], strides = [1, 1]} : vector<2x128xf32> to vector<2x32xf32>
    %97 = vector.extract_strided_slice %92 {offsets = [0, 96], sizes = [2, 32], strides = [1, 1]} : vector<2x128xf32> to vector<2x32xf32>
    %98 = arith.mulf %95, %81 : vector<2x32xf32>
    %99 = arith.mulf %94, %96 : vector<2x32xf32>
    %100 = arith.addf %98, %99 : vector<2x32xf32>
    %101 = math.tanh %100 : vector<2x32xf32>
    %102 = arith.mulf %97, %101 : vector<2x32xf32>
    %c8 = arith.constant 8 : index
    %c0_24 = arith.constant 0 : index
    %103 = vector.load %arg10[%c8, %c0_24] : memref<16x32xf32, #tpu.memory_space<vmem>>, vector<2x32xf32>
    tpu.vector_store %arg10[%c8, %c0_24], %102 {strides = array<i32>} : memref<16x32xf32, #tpu.memory_space<vmem>>, vector<2x32xf32>,
    %104 = vector.extract_strided_slice %5 {offsets = [10, 0], sizes = [2, 128], strides = [1, 1]} : vector<16x128xf32> to vector<2x128xf32>
    %cst_25 = arith.constant dense<0.000000e+00> : vector<2x128xf32>
    %105 = tpu.matmul %102, %6, %cst_25 {dimension_numbers = #tpu.dot_dimension_numbers<[1], [0], [0], [1], [0, 0, 1, 1], [], []>} : vector<2x32xf32>, vector<32x128xf32>, vector<2x128xf32> -> vector<2x128xf32>
    %106 = arith.addf %104, %105 : vector<2x128xf32>
    %107 = arith.negf %106 : vector<2x128xf32>
    %108 = math.exp %107 : vector<2x128xf32>
    %cst_26 = arith.constant 1.000000e+00 : f32
    %109 = vector.broadcast %cst_26 : f32 to vector<2x128xf32>
    %110 = arith.addf %109, %108 : vector<2x128xf32>
    %111 = arith.divf %109, %110 : vector<2x128xf32>
    %112 = math.tanh %106 : vector<2x128xf32>
    %113 = vector.extract_strided_slice %111 {offsets = [0, 0], sizes = [2, 32], strides = [1, 1]} : vector<2x128xf32> to vector<2x32xf32>
    %114 = vector.extract_strided_slice %111 {offsets = [0, 32], sizes = [2, 32], strides = [1, 1]} : vector<2x128xf32> to vector<2x32xf32>
    %115 = vector.extract_strided_slice %112 {offsets = [0, 64], sizes = [2, 32], strides = [1, 1]} : vector<2x128xf32> to vector<2x32xf32>
    %116 = vector.extract_strided_slice %111 {offsets = [0, 96], sizes = [2, 32], strides = [1, 1]} : vector<2x128xf32> to vector<2x32xf32>
    %117 = arith.mulf %114, %100 : vector<2x32xf32>
    %118 = arith.mulf %113, %115 : vector<2x32xf32>
    %119 = arith.addf %117, %118 : vector<2x32xf32>
    %120 = math.tanh %119 : vector<2x32xf32>
    %121 = arith.mulf %116, %120 : vector<2x32xf32>
    %c10 = arith.constant 10 : index
    %c0_27 = arith.constant 0 : index
    %122 = vector.load %arg10[%c10, %c0_27] : memref<16x32xf32, #tpu.memory_space<vmem>>, vector<2x32xf32>
    tpu.vector_store %arg10[%c10, %c0_27], %121 {strides = array<i32>} : memref<16x32xf32, #tpu.memory_space<vmem>>, vector<2x32xf32>,
    %123 = vector.extract_strided_slice %5 {offsets = [12, 0], sizes = [2, 128], strides = [1, 1]} : vector<16x128xf32> to vector<2x128xf32>
    %cst_28 = arith.constant dense<0.000000e+00> : vector<2x128xf32>
    %124 = tpu.matmul %121, %6, %cst_28 {dimension_numbers = #tpu.dot_dimension_numbers<[1], [0], [0], [1], [0, 0, 1, 1], [], []>} : vector<2x32xf32>, vector<32x128xf32>, vector<2x128xf32> -> vector<2x128xf32>
    %125 = arith.addf %123, %124 : vector<2x128xf32>
    %126 = arith.negf %125 : vector<2x128xf32>
    %127 = math.exp %126 : vector<2x128xf32>
    %cst_29 = arith.constant 1.000000e+00 : f32
    %128 = vector.broadcast %cst_29 : f32 to vector<2x128xf32>
    %129 = arith.addf %128, %127 : vector<2x128xf32>
    %130 = arith.divf %128, %129 : vector<2x128xf32>
    %131 = math.tanh %125 : vector<2x128xf32>
    %132 = vector.extract_strided_slice %130 {offsets = [0, 0], sizes = [2, 32], strides = [1, 1]} : vector<2x128xf32> to vector<2x32xf32>
    %133 = vector.extract_strided_slice %130 {offsets = [0, 32], sizes = [2, 32], strides = [1, 1]} : vector<2x128xf32> to vector<2x32xf32>
    %134 = vector.extract_strided_slice %131 {offsets = [0, 64], sizes = [2, 32], strides = [1, 1]} : vector<2x128xf32> to vector<2x32xf32>
    %135 = vector.extract_strided_slice %130 {offsets = [0, 96], sizes = [2, 32], strides = [1, 1]} : vector<2x128xf32> to vector<2x32xf32>
    %136 = arith.mulf %133, %119 : vector<2x32xf32>
    %137 = arith.mulf %132, %134 : vector<2x32xf32>
    %138 = arith.addf %136, %137 : vector<2x32xf32>
    %139 = math.tanh %138 : vector<2x32xf32>
    %140 = arith.mulf %135, %139 : vector<2x32xf32>
    %c12 = arith.constant 12 : index
    %c0_30 = arith.constant 0 : index
    %141 = vector.load %arg10[%c12, %c0_30] : memref<16x32xf32, #tpu.memory_space<vmem>>, vector<2x32xf32>
    tpu.vector_store %arg10[%c12, %c0_30], %140 {strides = array<i32>} : memref<16x32xf32, #tpu.memory_space<vmem>>, vector<2x32xf32>,
    %142 = vector.extract_strided_slice %5 {offsets = [14, 0], sizes = [2, 128], strides = [1, 1]} : vector<16x128xf32> to vector<2x128xf32>
    %cst_31 = arith.constant dense<0.000000e+00> : vector<2x128xf32>
    %143 = tpu.matmul %140, %6, %cst_31 {dimension_numbers = #tpu.dot_dimension_numbers<[1], [0], [0], [1], [0, 0, 1, 1], [], []>} : vector<2x32xf32>, vector<32x128xf32>, vector<2x128xf32> -> vector<2x128xf32>
    %144 = arith.addf %142, %143 : vector<2x128xf32>
    %145 = arith.negf %144 : vector<2x128xf32>
    %146 = math.exp %145 : vector<2x128xf32>
    %cst_32 = arith.constant 1.000000e+00 : f32
    %147 = vector.broadcast %cst_32 : f32 to vector<2x128xf32>
    %148 = arith.addf %147, %146 : vector<2x128xf32>
    %149 = arith.divf %147, %148 : vector<2x128xf32>
    %150 = math.tanh %144 : vector<2x128xf32>
    %151 = vector.extract_strided_slice %149 {offsets = [0, 0], sizes = [2, 32], strides = [1, 1]} : vector<2x128xf32> to vector<2x32xf32>
    %152 = vector.extract_strided_slice %149 {offsets = [0, 32], sizes = [2, 32], strides = [1, 1]} : vector<2x128xf32> to vector<2x32xf32>
    %153 = vector.extract_strided_slice %150 {offsets = [0, 64], sizes = [2, 32], strides = [1, 1]} : vector<2x128xf32> to vector<2x32xf32>
    %154 = vector.extract_strided_slice %149 {offsets = [0, 96], sizes = [2, 32], strides = [1, 1]} : vector<2x128xf32> to vector<2x32xf32>
    %155 = arith.mulf %152, %138 : vector<2x32xf32>
    %156 = arith.mulf %151, %153 : vector<2x32xf32>
    %157 = arith.addf %155, %156 : vector<2x32xf32>
    %158 = math.tanh %157 : vector<2x32xf32>
    %159 = arith.mulf %154, %158 : vector<2x32xf32>
    %c14 = arith.constant 14 : index
    %c0_33 = arith.constant 0 : index
    %160 = vector.load %arg10[%c14, %c0_33] : memref<16x32xf32, #tpu.memory_space<vmem>>, vector<2x32xf32>
    tpu.vector_store %arg10[%c14, %c0_33], %159 {strides = array<i32>} : memref<16x32xf32, #tpu.memory_space<vmem>>, vector<2x32xf32>,
    %c0_34 = arith.constant 0 : index
    %c0_35 = arith.constant 0 : index
    %161 = vector.load %arg10[%c0_34, %c0_35] : memref<16x32xf32, #tpu.memory_space<vmem>>, vector<16x32xf32>
    %c0_36 = arith.constant 0 : index
    %c0_37 = arith.constant 0 : index
    %162 = vector.load %arg4[%c0_36, %c0_37] : memref<32x128xf32, #tpu.memory_space<vmem>>, vector<32x128xf32>
    %cst_38 = arith.constant dense<0.000000e+00> : vector<16x128xf32>
    %163 = tpu.matmul %161, %162, %cst_38 {dimension_numbers = #tpu.dot_dimension_numbers<[1], [0], [0], [1], [0, 0, 1, 1], [], []>} : vector<16x32xf32>, vector<32x128xf32>, vector<16x128xf32> -> vector<16x128xf32>
    %c0_39 = arith.constant 0 : index
    %c0_40 = arith.constant 0 : index
    %164 = vector.load %arg6[%c0_39, %c0_40] : memref<1x128xf32, #tpu.memory_space<vmem>>, vector<1x128xf32>
    %165 = vector.broadcast %164 : vector<1x128xf32> to vector<16x128xf32>
    %166 = arith.addf %163, %165 : vector<16x128xf32>
    %c0_41 = arith.constant 0 : index
    %c0_42 = arith.constant 0 : index
    %167 = vector.load %arg5[%c0_41, %c0_42] : memref<32x128xf32, #tpu.memory_space<vmem>>, vector<32x128xf32>
    %cst_43 = arith.constant 0.000000e+00 : f32
    %168 = vector.broadcast %cst_43 : f32 to vector<2x32xf32>
    %cst_44 = arith.constant 0.000000e+00 : f32
    %169 = vector.broadcast %cst_44 : f32 to vector<2x32xf32>
    %170 = vector.extract_strided_slice %166 {offsets = [0, 0], sizes = [2, 128], strides = [1, 1]} : vector<16x128xf32> to vector<2x128xf32>
    %cst_45 = arith.constant dense<0.000000e+00> : vector<2x128xf32>
    %171 = tpu.matmul %168, %167, %cst_45 {dimension_numbers = #tpu.dot_dimension_numbers<[1], [0], [0], [1], [0, 0, 1, 1], [], []>} : vector<2x32xf32>, vector<32x128xf32>, vector<2x128xf32> -> vector<2x128xf32>
    %172 = arith.addf %170, %171 : vector<2x128xf32>
    %173 = arith.negf %172 : vector<2x128xf32>
    %174 = math.exp %173 : vector<2x128xf32>
    %cst_46 = arith.constant 1.000000e+00 : f32
    %175 = vector.broadcast %cst_46 : f32 to vector<2x128xf32>
    %176 = arith.addf %175, %174 : vector<2x128xf32>
    %177 = arith.divf %175, %176 : vector<2x128xf32>
    %178 = math.tanh %172 : vector<2x128xf32>
    %179 = vector.extract_strided_slice %177 {offsets = [0, 0], sizes = [2, 32], strides = [1, 1]} : vector<2x128xf32> to vector<2x32xf32>
    %180 = vector.extract_strided_slice %177 {offsets = [0, 32], sizes = [2, 32], strides = [1, 1]} : vector<2x128xf32> to vector<2x32xf32>
    %181 = vector.extract_strided_slice %178 {offsets = [0, 64], sizes = [2, 32], strides = [1, 1]} : vector<2x128xf32> to vector<2x32xf32>
    %182 = vector.extract_strided_slice %177 {offsets = [0, 96], sizes = [2, 32], strides = [1, 1]} : vector<2x128xf32> to vector<2x32xf32>
    %183 = arith.mulf %180, %169 : vector<2x32xf32>
    %184 = arith.mulf %179, %181 : vector<2x32xf32>
    %185 = arith.addf %183, %184 : vector<2x32xf32>
    %186 = math.tanh %185 : vector<2x32xf32>
    %187 = arith.mulf %182, %186 : vector<2x32xf32>
    %188 = vector.extract_strided_slice %166 {offsets = [2, 0], sizes = [2, 128], strides = [1, 1]} : vector<16x128xf32> to vector<2x128xf32>
    %cst_47 = arith.constant dense<0.000000e+00> : vector<2x128xf32>
    %189 = tpu.matmul %187, %167, %cst_47 {dimension_numbers = #tpu.dot_dimension_numbers<[1], [0], [0], [1], [0, 0, 1, 1], [], []>} : vector<2x32xf32>, vector<32x128xf32>, vector<2x128xf32> -> vector<2x128xf32>
    %190 = arith.addf %188, %189 : vector<2x128xf32>
    %191 = arith.negf %190 : vector<2x128xf32>
    %192 = math.exp %191 : vector<2x128xf32>
    %cst_48 = arith.constant 1.000000e+00 : f32
    %193 = vector.broadcast %cst_48 : f32 to vector<2x128xf32>
    %194 = arith.addf %193, %192 : vector<2x128xf32>
    %195 = arith.divf %193, %194 : vector<2x128xf32>
    %196 = math.tanh %190 : vector<2x128xf32>
    %197 = vector.extract_strided_slice %195 {offsets = [0, 0], sizes = [2, 32], strides = [1, 1]} : vector<2x128xf32> to vector<2x32xf32>
    %198 = vector.extract_strided_slice %195 {offsets = [0, 32], sizes = [2, 32], strides = [1, 1]} : vector<2x128xf32> to vector<2x32xf32>
    %199 = vector.extract_strided_slice %196 {offsets = [0, 64], sizes = [2, 32], strides = [1, 1]} : vector<2x128xf32> to vector<2x32xf32>
    %200 = vector.extract_strided_slice %195 {offsets = [0, 96], sizes = [2, 32], strides = [1, 1]} : vector<2x128xf32> to vector<2x32xf32>
    %201 = arith.mulf %198, %185 : vector<2x32xf32>
    %202 = arith.mulf %197, %199 : vector<2x32xf32>
    %203 = arith.addf %201, %202 : vector<2x32xf32>
    %204 = math.tanh %203 : vector<2x32xf32>
    %205 = arith.mulf %200, %204 : vector<2x32xf32>
    %206 = vector.extract_strided_slice %166 {offsets = [4, 0], sizes = [2, 128], strides = [1, 1]} : vector<16x128xf32> to vector<2x128xf32>
    %cst_49 = arith.constant dense<0.000000e+00> : vector<2x128xf32>
    %207 = tpu.matmul %205, %167, %cst_49 {dimension_numbers = #tpu.dot_dimension_numbers<[1], [0], [0], [1], [0, 0, 1, 1], [], []>} : vector<2x32xf32>, vector<32x128xf32>, vector<2x128xf32> -> vector<2x128xf32>
    %208 = arith.addf %206, %207 : vector<2x128xf32>
    %209 = arith.negf %208 : vector<2x128xf32>
    %210 = math.exp %209 : vector<2x128xf32>
    %cst_50 = arith.constant 1.000000e+00 : f32
    %211 = vector.broadcast %cst_50 : f32 to vector<2x128xf32>
    %212 = arith.addf %211, %210 : vector<2x128xf32>
    %213 = arith.divf %211, %212 : vector<2x128xf32>
    %214 = math.tanh %208 : vector<2x128xf32>
    %215 = vector.extract_strided_slice %213 {offsets = [0, 0], sizes = [2, 32], strides = [1, 1]} : vector<2x128xf32> to vector<2x32xf32>
    %216 = vector.extract_strided_slice %213 {offsets = [0, 32], sizes = [2, 32], strides = [1, 1]} : vector<2x128xf32> to vector<2x32xf32>
    %217 = vector.extract_strided_slice %214 {offsets = [0, 64], sizes = [2, 32], strides = [1, 1]} : vector<2x128xf32> to vector<2x32xf32>
    %218 = vector.extract_strided_slice %213 {offsets = [0, 96], sizes = [2, 32], strides = [1, 1]} : vector<2x128xf32> to vector<2x32xf32>
    %219 = arith.mulf %216, %203 : vector<2x32xf32>
    %220 = arith.mulf %215, %217 : vector<2x32xf32>
    %221 = arith.addf %219, %220 : vector<2x32xf32>
    %222 = math.tanh %221 : vector<2x32xf32>
    %223 = arith.mulf %218, %222 : vector<2x32xf32>
    %224 = vector.extract_strided_slice %166 {offsets = [6, 0], sizes = [2, 128], strides = [1, 1]} : vector<16x128xf32> to vector<2x128xf32>
    %cst_51 = arith.constant dense<0.000000e+00> : vector<2x128xf32>
    %225 = tpu.matmul %223, %167, %cst_51 {dimension_numbers = #tpu.dot_dimension_numbers<[1], [0], [0], [1], [0, 0, 1, 1], [], []>} : vector<2x32xf32>, vector<32x128xf32>, vector<2x128xf32> -> vector<2x128xf32>
    %226 = arith.addf %224, %225 : vector<2x128xf32>
    %227 = arith.negf %226 : vector<2x128xf32>
    %228 = math.exp %227 : vector<2x128xf32>
    %cst_52 = arith.constant 1.000000e+00 : f32
    %229 = vector.broadcast %cst_52 : f32 to vector<2x128xf32>
    %230 = arith.addf %229, %228 : vector<2x128xf32>
    %231 = arith.divf %229, %230 : vector<2x128xf32>
    %232 = math.tanh %226 : vector<2x128xf32>
    %233 = vector.extract_strided_slice %231 {offsets = [0, 0], sizes = [2, 32], strides = [1, 1]} : vector<2x128xf32> to vector<2x32xf32>
    %234 = vector.extract_strided_slice %231 {offsets = [0, 32], sizes = [2, 32], strides = [1, 1]} : vector<2x128xf32> to vector<2x32xf32>
    %235 = vector.extract_strided_slice %232 {offsets = [0, 64], sizes = [2, 32], strides = [1, 1]} : vector<2x128xf32> to vector<2x32xf32>
    %236 = vector.extract_strided_slice %231 {offsets = [0, 96], sizes = [2, 32], strides = [1, 1]} : vector<2x128xf32> to vector<2x32xf32>
    %237 = arith.mulf %234, %221 : vector<2x32xf32>
    %238 = arith.mulf %233, %235 : vector<2x32xf32>
    %239 = arith.addf %237, %238 : vector<2x32xf32>
    %240 = math.tanh %239 : vector<2x32xf32>
    %241 = arith.mulf %236, %240 : vector<2x32xf32>
    %242 = vector.extract_strided_slice %166 {offsets = [8, 0], sizes = [2, 128], strides = [1, 1]} : vector<16x128xf32> to vector<2x128xf32>
    %cst_53 = arith.constant dense<0.000000e+00> : vector<2x128xf32>
    %243 = tpu.matmul %241, %167, %cst_53 {dimension_numbers = #tpu.dot_dimension_numbers<[1], [0], [0], [1], [0, 0, 1, 1], [], []>} : vector<2x32xf32>, vector<32x128xf32>, vector<2x128xf32> -> vector<2x128xf32>
    %244 = arith.addf %242, %243 : vector<2x128xf32>
    %245 = arith.negf %244 : vector<2x128xf32>
    %246 = math.exp %245 : vector<2x128xf32>
    %cst_54 = arith.constant 1.000000e+00 : f32
    %247 = vector.broadcast %cst_54 : f32 to vector<2x128xf32>
    %248 = arith.addf %247, %246 : vector<2x128xf32>
    %249 = arith.divf %247, %248 : vector<2x128xf32>
    %250 = math.tanh %244 : vector<2x128xf32>
    %251 = vector.extract_strided_slice %249 {offsets = [0, 0], sizes = [2, 32], strides = [1, 1]} : vector<2x128xf32> to vector<2x32xf32>
    %252 = vector.extract_strided_slice %249 {offsets = [0, 32], sizes = [2, 32], strides = [1, 1]} : vector<2x128xf32> to vector<2x32xf32>
    %253 = vector.extract_strided_slice %250 {offsets = [0, 64], sizes = [2, 32], strides = [1, 1]} : vector<2x128xf32> to vector<2x32xf32>
    %254 = vector.extract_strided_slice %249 {offsets = [0, 96], sizes = [2, 32], strides = [1, 1]} : vector<2x128xf32> to vector<2x32xf32>
    %255 = arith.mulf %252, %239 : vector<2x32xf32>
    %256 = arith.mulf %251, %253 : vector<2x32xf32>
    %257 = arith.addf %255, %256 : vector<2x32xf32>
    %258 = math.tanh %257 : vector<2x32xf32>
    %259 = arith.mulf %254, %258 : vector<2x32xf32>
    %260 = vector.extract_strided_slice %166 {offsets = [10, 0], sizes = [2, 128], strides = [1, 1]} : vector<16x128xf32> to vector<2x128xf32>
    %cst_55 = arith.constant dense<0.000000e+00> : vector<2x128xf32>
    %261 = tpu.matmul %259, %167, %cst_55 {dimension_numbers = #tpu.dot_dimension_numbers<[1], [0], [0], [1], [0, 0, 1, 1], [], []>} : vector<2x32xf32>, vector<32x128xf32>, vector<2x128xf32> -> vector<2x128xf32>
    %262 = arith.addf %260, %261 : vector<2x128xf32>
    %263 = arith.negf %262 : vector<2x128xf32>
    %264 = math.exp %263 : vector<2x128xf32>
    %cst_56 = arith.constant 1.000000e+00 : f32
    %265 = vector.broadcast %cst_56 : f32 to vector<2x128xf32>
    %266 = arith.addf %265, %264 : vector<2x128xf32>
    %267 = arith.divf %265, %266 : vector<2x128xf32>
    %268 = math.tanh %262 : vector<2x128xf32>
    %269 = vector.extract_strided_slice %267 {offsets = [0, 0], sizes = [2, 32], strides = [1, 1]} : vector<2x128xf32> to vector<2x32xf32>
    %270 = vector.extract_strided_slice %267 {offsets = [0, 32], sizes = [2, 32], strides = [1, 1]} : vector<2x128xf32> to vector<2x32xf32>
    %271 = vector.extract_strided_slice %268 {offsets = [0, 64], sizes = [2, 32], strides = [1, 1]} : vector<2x128xf32> to vector<2x32xf32>
    %272 = vector.extract_strided_slice %267 {offsets = [0, 96], sizes = [2, 32], strides = [1, 1]} : vector<2x128xf32> to vector<2x32xf32>
    %273 = arith.mulf %270, %257 : vector<2x32xf32>
    %274 = arith.mulf %269, %271 : vector<2x32xf32>
    %275 = arith.addf %273, %274 : vector<2x32xf32>
    %276 = math.tanh %275 : vector<2x32xf32>
    %277 = arith.mulf %272, %276 : vector<2x32xf32>
    %278 = vector.extract_strided_slice %166 {offsets = [12, 0], sizes = [2, 128], strides = [1, 1]} : vector<16x128xf32> to vector<2x128xf32>
    %cst_57 = arith.constant dense<0.000000e+00> : vector<2x128xf32>
    %279 = tpu.matmul %277, %167, %cst_57 {dimension_numbers = #tpu.dot_dimension_numbers<[1], [0], [0], [1], [0, 0, 1, 1], [], []>} : vector<2x32xf32>, vector<32x128xf32>, vector<2x128xf32> -> vector<2x128xf32>
    %280 = arith.addf %278, %279 : vector<2x128xf32>
    %281 = arith.negf %280 : vector<2x128xf32>
    %282 = math.exp %281 : vector<2x128xf32>
    %cst_58 = arith.constant 1.000000e+00 : f32
    %283 = vector.broadcast %cst_58 : f32 to vector<2x128xf32>
    %284 = arith.addf %283, %282 : vector<2x128xf32>
    %285 = arith.divf %283, %284 : vector<2x128xf32>
    %286 = math.tanh %280 : vector<2x128xf32>
    %287 = vector.extract_strided_slice %285 {offsets = [0, 0], sizes = [2, 32], strides = [1, 1]} : vector<2x128xf32> to vector<2x32xf32>
    %288 = vector.extract_strided_slice %285 {offsets = [0, 32], sizes = [2, 32], strides = [1, 1]} : vector<2x128xf32> to vector<2x32xf32>
    %289 = vector.extract_strided_slice %286 {offsets = [0, 64], sizes = [2, 32], strides = [1, 1]} : vector<2x128xf32> to vector<2x32xf32>
    %290 = vector.extract_strided_slice %285 {offsets = [0, 96], sizes = [2, 32], strides = [1, 1]} : vector<2x128xf32> to vector<2x32xf32>
    %291 = arith.mulf %288, %275 : vector<2x32xf32>
    %292 = arith.mulf %287, %289 : vector<2x32xf32>
    %293 = arith.addf %291, %292 : vector<2x32xf32>
    %294 = math.tanh %293 : vector<2x32xf32>
    %295 = arith.mulf %290, %294 : vector<2x32xf32>
    %296 = vector.extract_strided_slice %166 {offsets = [14, 0], sizes = [2, 128], strides = [1, 1]} : vector<16x128xf32> to vector<2x128xf32>
    %cst_59 = arith.constant dense<0.000000e+00> : vector<2x128xf32>
    %297 = tpu.matmul %295, %167, %cst_59 {dimension_numbers = #tpu.dot_dimension_numbers<[1], [0], [0], [1], [0, 0, 1, 1], [], []>} : vector<2x32xf32>, vector<32x128xf32>, vector<2x128xf32> -> vector<2x128xf32>
    %298 = arith.addf %296, %297 : vector<2x128xf32>
    %299 = arith.negf %298 : vector<2x128xf32>
    %300 = math.exp %299 : vector<2x128xf32>
    %cst_60 = arith.constant 1.000000e+00 : f32
    %301 = vector.broadcast %cst_60 : f32 to vector<2x128xf32>
    %302 = arith.addf %301, %300 : vector<2x128xf32>
    %303 = arith.divf %301, %302 : vector<2x128xf32>
    %304 = math.tanh %298 : vector<2x128xf32>
    %305 = vector.extract_strided_slice %303 {offsets = [0, 0], sizes = [2, 32], strides = [1, 1]} : vector<2x128xf32> to vector<2x32xf32>
    %306 = vector.extract_strided_slice %303 {offsets = [0, 32], sizes = [2, 32], strides = [1, 1]} : vector<2x128xf32> to vector<2x32xf32>
    %307 = vector.extract_strided_slice %304 {offsets = [0, 64], sizes = [2, 32], strides = [1, 1]} : vector<2x128xf32> to vector<2x32xf32>
    %308 = vector.extract_strided_slice %303 {offsets = [0, 96], sizes = [2, 32], strides = [1, 1]} : vector<2x128xf32> to vector<2x32xf32>
    %309 = arith.mulf %306, %293 : vector<2x32xf32>
    %310 = arith.mulf %305, %307 : vector<2x32xf32>
    %311 = arith.addf %309, %310 : vector<2x32xf32>
    %312 = math.tanh %311 : vector<2x32xf32>
    %313 = arith.mulf %308, %312 : vector<2x32xf32>
    %314 = tpu.concatenate %159, %313 in 0 : vector<2x32xf32>, vector<2x32xf32> -> vector<4x32xf32>
    %c0_61 = arith.constant 0 : index
    %c0_62 = arith.constant 0 : index
    %315 = vector.load %arg7[%c0_61, %c0_62] : memref<32x8xf32, #tpu.memory_space<vmem>>, vector<32x8xf32>
    %cst_63 = arith.constant dense<0.000000e+00> : vector<4x8xf32>
    %316 = tpu.matmul %314, %315, %cst_63 {dimension_numbers = #tpu.dot_dimension_numbers<[1], [0], [0], [1], [0, 0, 1, 1], [], []>} : vector<4x32xf32>, vector<32x8xf32>, vector<4x8xf32> -> vector<4x8xf32>
    %c0_64 = arith.constant 0 : index
    %c0_65 = arith.constant 0 : index
    %317 = vector.load %arg8[%c0_64, %c0_65] : memref<1x8xf32, #tpu.memory_space<vmem>>, vector<1x8xf32>
    %318 = vector.broadcast %317 : vector<1x8xf32> to vector<4x8xf32>
    %319 = arith.addf %316, %318 : vector<4x8xf32>
    %c0_66 = arith.constant 0 : index
    %c0_67 = arith.constant 0 : index
    %320 = vector.load %arg9[%c0_66, %c0_67] : memref<4x8xf32, #tpu.memory_space<vmem>>, vector<4x8xf32>
    tpu.vector_store %arg9[%c0_66, %c0_67], %319 {strides = array<i32>} : memref<4x8xf32, #tpu.memory_space<vmem>>, vector<4x8xf32>,
    return
  }
}

</mosaic_0001>

<bundles_post_ra>
// kernel: tpu_custom_call.1
= control target key start
LH: loop header
LB: loop body
LE: loop exit
PB: predicated region body
PF: predicated region fallthrough
CT: control target
= control target key end

     0   :  { %14 = vsyncpa [#allocation4], 0  ;;  %s3136_s0 = inlined_call_operand.vmem [shape: f32[16,8], index: 0, kind: input, shape index: {}]   ;;  %s3137_s1 = inlined_call_operand.hbm [shape: f32[8,128], index: 1, kind: input, shape index: {}]   ;;  %s3138_s2 = inlined_call_operand.vmem [shape: f32[32,128], index: 2, kind: input, shape index: {}]   ;;  %s3139_s3 = inlined_call_operand.vmem [shape: f32[1,128], index: 3, kind: input, shape index: {}]   ;;  %s3140_s4 = inlined_call_operand.vmem [shape: f32[32,128], index: 4, kind: input, shape index: {}]   ;;  %s3141_s5 = inlined_call_operand.hbm [shape: f32[32,128], index: 5, kind: input, shape index: {}]   ;;  %s3142_s6 = inlined_call_operand.vmem [shape: f32[1,128], index: 6, kind: input, shape index: {}]   ;;  %s3143_s7 = inlined_call_operand.vmem [shape: f32[32,8], index: 7, kind: input, shape index: {}]   ;;  %s3144_s8 = inlined_call_operand.vmem [shape: f32[1,8], index: 8, kind: input, shape index: {}]   ;;  %s3145_s9 = inlined_call_operand.hbm [shape: f32[4,8], index: 9, kind: output, shape index: {}]  }
   0x1   :  { %15 = vsyncpa [#allocation7], 0 }
   0x2   :  { %16 = vsyncpa [#allocation5], 0  ;;  %s2734_s30 = smov [#allocation3]   ;;  %s2735_s11 = smov [#allocation6]  }
   0x3   :  { %s25_s10 = sshll.u32 %s2734_s30, 4  ;;  %s40_s12 = sshll.u32 %s2735_s11, 4  ;;  %s26_s10 = int_to_ptr.vmem [resolvable:$true] %s25_s10  ;;  %s2794_s12 = int_to_ptr.vmem [resolvable:$true] %s40_s12 }
   0x4   :  { %s2662_s15 = scalar_lea.hbm %s3137_s1, 128 }
   0x5   :  { %p2663_p0 = scmp.ne.s32.totalorder %s3137_s1, %s2662_s15  ;;  %p2666_p1 = scmp.lt.u32.totalorder %s2662_s15, %s3137_s1 }
   0x7   :  { %p2668_p2 = pnand %p2666_p1, %p2663_p0 }
   0x9   :  { %2671 = shalt.err (!%p2668_p2)
}
   0xa   :  { %s2672_s20 = scalar_lea.vmem %s26_s10, 128  ;;  %p2677_p4 = scmp.lt.s32.totalorder %s26_s10, %s26_s10 }
   0xb   :  { %p2673_p3 = scmp.ne.s32.totalorder %s26_s10, %s2672_s20  ;;  %p2678_p5 = scmp.lt.s32.totalorder %s2672_s20, %s2672_s20 }
   0xd   :  { %p2679_p6 = por %p2678_p5, %p2677_p4 }
   0xf   :  { %p2680_p7 = pnand %p2679_p6, %p2673_p3 }
  0x11   :  { %2683 = shalt.err (!%p2680_p7)
}
  0x12   :  { %28 = dma.hbm_to_vmem [thread:$0]  %s3137_s1, 128, %s26_s10, [#allocation4]  }
  0x13   :  { %s2684_s25 = scalar_lea.hbm %s3141_s5, 512 }
  0x14   :  { %p2685_p8 = scmp.ne.s32.totalorder %s3141_s5, %s2684_s25  ;;  %p2688_p9 = scmp.lt.u32.totalorder %s2684_s25, %s3141_s5 }
  0x16   :  { %p2690_p10 = pnand %p2688_p9, %p2685_p8 }
  0x18   :  { %2693 = shalt.err (!%p2690_p10)
}
  0x19   :  { %s2694_s30 = scalar_lea.vmem %s2794_s12, 512  ;;  %p2699_p12 = scmp.lt.s32.totalorder %s2794_s12, %s2794_s12 }
  0x1a   :  { %p2695_p11 = scmp.ne.s32.totalorder %s2794_s12, %s2694_s30  ;;  %p2700_p13 = scmp.lt.s32.totalorder %s2694_s30, %s2694_s30 }
  0x1c   :  { %p2701_p0 = por %p2700_p13, %p2699_p12 }
  0x1e   :  { %p2702_p1 = pnand %p2701_p0, %p2695_p11 }
  0x20   :  { %2705 = shalt.err (!%p2702_p1)
}
  0x21   :  { %s2736_s1 = smov 128   ;;  %s2737_s10 = smov 8  }
  0x22   :  { %46 = dma.hbm_to_vmem [thread:$0]  %s3141_s5, 512, %s2794_s12, [#allocation7], %s2736_s1, %s2736_s1, %s2737_s10  }
  0x23   :  { %2728 = dma.done.wait [#allocation4], 128  }
  0x24   :  { %2729 = vsyncadd [#allocation4], 4294967168 }
  0x25   :  { %2730 = dma.done.wait [#allocation7], 512  }
  0x26   :  { %2731 = vsyncadd [#allocation7], 4294966784  ;;  %v2738_v0 = vmov 0.0|0.0   ;;  %vm2739_vm0 = vmmov 0   ;;  %v2740_v1 = vmov 0.0   ;;  %vm69_vm1 = vcmask 64512  }
  0x27   :  { %2414 = vmatprep.subr.bf16.mxu1 %v2738_v0  ;;  %2224 = vmatprep.mubr.msk.f32.mxu1 %vm2739_vm0, %v2740_v1  ;;  %v151_v2 = vld [vmem:[%s3138_s2] sm:$0xff]  ;;  %v152_v3 = vld [vmem:[%s3138_s2 + $0x8] sm:$0xff]  ;;  %v61_v4 = vld [vmem:[#allocation3] sm:$0xff]  ;;  %s2741_s24 = smov 64   ;;  %vm258_vm2 = vcmask 254976   ;;  %vm155_vm3 = vcmask 261120  }
  0x28   :  { %v2834_v5 = vpack.c.bf16 %v152_v3, %v151_v2  ;;  %2211 = vmatprep.subr.mxu0 %v61_v4  ;;  %v59_v6 = vld [vmem:[%s3136_s0] sm:$0xff]  ;;  %v60_v7 = vld [vmem:[%s3136_s0 + $0x8] sm:$0xff]  ;;  %v153_v8 = vld [vmem:[%s3138_s2 + $0x10] sm:$0xff]  ;;  %vm367_vm4 = vcmask 257026   ;;  %vm591_vm5 = vcmask 261126   ;;  %vm479_vm6 = vcmask 259076  }
  0x29   :  { %2212 = vmatpush3.msra.mxu0 %v61_v4  ;;  %2213 = vmatprep.mubr.msk.f32.mxu0 %vm69_vm1, %v59_v6  ;;  %v154_v9 = vld [vmem:[%s3138_s2 + $0x18] sm:$0xff]  ;;  %v2079_v11 = vld [vmem:[%s3139_s3] ss:$0 sm:$0xff]  ;;  %s2742_s3 = smov 32   ;;  %vm1973_vm7 = vcmask 1041408   ;;  %s2743_s19 = smov [#allocation8]  }
  0x2a   :  { %2416 = vmatpush3.bf16.msra.mxu1 %v2834_v5  ;;  %2214 = vmatmul.mubr.msk.f32.vlgmr.msra.gmra.mrb[0].mxu0 %vm69_vm1, %v60_v7  ;;  %v2849_v10 = vpack.c.bf16 %v154_v9, %v153_v8  ;;  %s2069_s20 = sshll.u32 %s2743_s19, 4  ;;  %vm2061_vm8 = vcmask 60416   ;;  %s2070_s20 = int_to_ptr.vmem [resolvable:$true] %s2069_s20 }
  0x2b   :  { %2417 = vmatprep.subr.bf16.mxu1 %v2738_v0  ;;  %2420 = vmatprep.subr.bf16.mxu0 %v2738_v0  ;;  %s2706_s21 = scalar_lea.vmem %s2070_s20, 64  ;;  %p2711_p3 = scmp.lt.s32.totalorder %s2070_s20, %s2070_s20 }
  0x2c   :  { %2422 = vmatpush3.bf16.msra.mxu0 %v2834_v5  ;;  %2235 = vmatprep.mubr.msk.f32.mxu0 %vm2739_vm0, %v2740_v1  ;;  %p2707_p2 = scmp.ne.s32.totalorder %s2070_s20, %s2706_s21  ;;  %p2712_p4 = scmp.lt.s32.totalorder %s2706_s21, %s2706_s21 }
  0x2d   :  { %2423 = vmatprep.subr.bf16.mxu0 %v2738_v0 }
  0x2e   :  { %2419 = vmatpush3.bf16.msra.mxu1 %v2849_v10  ;;  %p2713_p5 = por %p2712_p4, %p2711_p3 }
  0x2f   :  { %2426 = vmatprep.subr.bf16.mxu1 %v2738_v0 }
  0x30   :  { %2425 = vmatpush3.bf16.msra.mxu0 %v2849_v10  ;;  %p2714_p6 = pnand %p2713_p5, %p2707_p2 }
  0x31   :  { %2225 = vmatmul.mubr.f32.vlgmr.msra.gmra.mrb[0].mxu1 %v2740_v1  ;;  %2432 = vmatprep.subr.bf16.mxu0 %v2738_v0 }
  0x32   :  { %2428 = vmatpush3.bf16.msra.mxu1 %v2834_v5  ;;  %2246 = vmatprep.mubr.msk.f32.mxu1 %vm2739_vm0, %v2740_v1 }
  0x33   :  { %2429 = vmatprep.subr.bf16.mxu1 %v2738_v0 }
  0x36   :  { %2431 = vmatpush3.bf16.msra.mxu1 %v2849_v10 }
  0x37   :  { %2438 = vmatprep.subr.bf16.mxu1 %v2738_v0 }
  0xfd   :  { %v2215_v12 = vpop.f32.mrb[0].mxu0 }
  0xfe   :  { %v2871_v13 = vadd.f32 %v2215_v12, %v2079_v11  ;;  %v142_v14 = vpop.f32.mrb[1].mxu0 }
  0xff   :  { %v2873_v15 = vadd.f32 %v2079_v11, %v142_v14 }
 0x104   :  { %v225_v16 = vpop.f32.mrb[0].mxu1 }
 0x105   :  { %v229_v17 = vadd.f32 %v225_v16, %v2873_v15  ;;  %v2226_v18 = vpop.f32.mrb[1].mxu1 }
 0x107   :  { %2534 = vtanh.f32 %v229_v17  ;;  %v2082_v20 = vmul.f32 -1.442695, %v229_v17 }
 0x109   :  { %2536 = vpow2.f32 %v2082_v20 }
 0x111   :  { %v2535_v19 = vpop.eup %2534 }
 0x112   :  { %239 = vrot.lane.b32.xlu0 %v2535_v19, %s2741_s24 }
 0x113   :  { %v2537_v21 = vpop.eup %2536 }
 0x114   :  { %v233_v22 = vadd.f32 1.0, %v2537_v21 }
 0x116   :  { %2538 = vrcp.f32 %v233_v22 }
 0x120   :  { %v2539_v23 = vpop.eup %2538 }
 0x121   :  { %v237_v26 = vmul.f32 0.0, %v2539_v23 }
 0x184   :  { %v240_v24 = vpop.permute.xlu0 %239 }
 0x185   :  { %v242_v25 = vmul.f32 %v2539_v23, %v240_v24 }
 0x187   :  { %244 = vrot.lane.b32.xlu0 %v242_v25, %s2742_s3 }
 0x1f9   :  { %v245_v27 = vpop.permute.xlu0 %244 }
 0x1fa   :  { %v247_v28 = vadd.f32 %v245_v27, %v237_v26 }
 0x1fc   :  { %2540 = vtanh.f32 %v247_v28  ;;  %v344_v44 = vrot.slane %v247_v28, 6 }
 0x206   :  { %v2541_v29 = vpop.eup %2540 }
 0x207   :  { %250 = vrot.lane.b32.xlu1 %v2541_v29, %s2741_s24 }
 0x279   :  { %v251_v30 = vpop.permute.xlu1 %250 }
 0x27a   :  { %v253_v31 = vmul.f32 %v2539_v23, %v251_v30 }
 0x27c   :  { %255 = vrot.lane.b32.xlu1 %v253_v31, %s2742_s3 }
 0x2ee   :  { %v256_v32 = vpop.permute.xlu1 %255 }
 0x2ef   :  { %259 = vst.msk [vmem:[#allocation2] sm:$0x3] %vm258_vm2, %v256_v32  ;;  %2236 = vmatmul.mubr.msk.f32.vlgmr.msra.gmra.mrb[2].mxu0 %vm155_vm3, %v256_v32 }
 0x2f0   :  { %2434 = vmatpush3.bf16.msra.mxu0 %v2834_v5  ;;  %2257 = vmatprep.mubr.msk.f32.mxu0 %vm2739_vm0, %v2740_v1 }
 0x2f1   :  { %2435 = vmatprep.subr.bf16.mxu0 %v2738_v0 }
 0x2f4   :  { %2437 = vmatpush3.bf16.msra.mxu0 %v2849_v10 }
 0x2f5   :  { %2444 = vmatprep.subr.bf16.mxu0 %v2738_v0 }
 0x3c2   :  { %v328_v33 = vpop.f32.mrb[2].mxu0 }
 0x3c3   :  { %v333_v34 = vrot.slane %v328_v33, 6  ;;  %v2237_v35 = vpop.f32.mrb[3].mxu0 }
 0x3c5   :  { %v335_v36 = vadd.f32 %v333_v34, %v2873_v15 }
 0x3c7   :  { %2542 = vtanh.f32 %v335_v36  ;;  %v2084_v38 = vmul.f32 -1.442695, %v335_v36 }
 0x3c9   :  { %2544 = vpow2.f32 %v2084_v38 }
 0x3d1   :  { %v2543_v37 = vpop.eup %2542 }
 0x3d2   :  { %348 = vrot.lane.b32.xlu0 %v2543_v37, %s2741_s24 }
 0x3d3   :  { %v2545_v39 = vpop.eup %2544 }
 0x3d4   :  { %v339_v40 = vadd.f32 1.0, %v2545_v39 }
 0x3d6   :  { %2546 = vrcp.f32 %v339_v40 }
 0x3e0   :  { %v2547_v41 = vpop.eup %2546 }
 0x3e1   :  { %v346_v45 = vmul.f32 %v2547_v41, %v344_v44 }
 0x444   :  { %v349_v42 = vpop.permute.xlu0 %348 }
 0x445   :  { %v351_v43 = vmul.f32 %v2547_v41, %v349_v42 }
 0x447   :  { %353 = vrot.lane.b32.xlu1 %v351_v43, %s2742_s3 }
 0x4b9   :  { %v354_v46 = vpop.permute.xlu1 %353 }
 0x4ba   :  { %v356_v47 = vadd.f32 %v354_v46, %v346_v45 }
 0x4bc   :  { %2548 = vtanh.f32 %v356_v47  ;;  %v456_v2 = vrot.slane %v356_v47, 6 }
 0x4c6   :  { %v2549_v48 = vpop.eup %2548 }
 0x4c7   :  { %359 = vrot.lane.b32.xlu0 %v2549_v48, %s2741_s24 }
 0x539   :  { %v360_v49 = vpop.permute.xlu0 %359 }
 0x53a   :  { %v2892_v50 = vmul.f32 %v2547_v41, %v360_v49 }
 0x53c   :  { %v369_v51 = vrot.slane %v2892_v50, 2 }
 0x53e   :  { %370 = vrot.lane.b32.xlu1 %v369_v51, %s2742_s3 }
 0x5b0   :  { %v371_v52 = vpop.permute.xlu1 %370 }
 0x5b1   :  { %2247 = vmatmul.mubr.msk.f32.vlgmr.msra.gmra.mrb[2].mxu1 %vm155_vm3, %v371_v52 }
 0x5b2   :  { %2440 = vmatpush3.bf16.msra.mxu1 %v2834_v5  ;;  %2268 = vmatprep.mubr.msk.f32.mxu1 %vm2739_vm0, %v2740_v1 }
 0x5b3   :  { %2441 = vmatprep.subr.bf16.mxu1 %v2738_v0 }
 0x5b6   :  { %2443 = vmatpush3.bf16.msra.mxu1 %v2849_v10 }
 0x5b7   :  { %2450 = vmatprep.subr.bf16.mxu1 %v2738_v0 }
 0x684   :  { %v440_v53 = vpop.f32.mrb[2].mxu1 }
 0x685   :  { %v445_v54 = vrot.slane %v440_v53, 4  ;;  %v2248_v55 = vpop.f32.mrb[3].mxu1 }
 0x687   :  { %v447_v56 = vadd.f32 %v445_v54, %v2873_v15 }
 0x689   :  { %2550 = vtanh.f32 %v447_v56  ;;  %v2086_v58 = vmul.f32 -1.442695, %v447_v56 }
 0x68b   :  { %2552 = vpow2.f32 %v2086_v58 }
 0x693   :  { %v2551_v57 = vpop.eup %2550 }
 0x694   :  { %460 = vrot.lane.b32.xlu0 %v2551_v57, %s2741_s24 }
 0x695   :  { %v2553_v59 = vpop.eup %2552 }
 0x696   :  { %v451_v60 = vadd.f32 1.0, %v2553_v59 }
 0x698   :  { %2554 = vrcp.f32 %v451_v60 }
 0x6a2   :  { %v2555_v61 = vpop.eup %2554 }
 0x6a3   :  { %v458_v3 = vmul.f32 %v2555_v61, %v456_v2 }
 0x706   :  { %v461_v62 = vpop.permute.xlu0 %460 }
 0x707   :  { %v463_v63 = vmul.f32 %v2555_v61, %v461_v62 }
 0x709   :  { %465 = vrot.lane.b32.xlu1 %v463_v63, %s2742_s3 }
 0x77b   :  { %v466_v4 = vpop.permute.xlu1 %465 }
 0x77c   :  { %v468_v6 = vadd.f32 %v466_v4, %v458_v3 }
 0x77e   :  { %2556 = vtanh.f32 %v468_v6  ;;  %v568_v26 = vrot.slane %v468_v6, 6 }
 0x788   :  { %v2557_v7 = vpop.eup %2556 }
 0x789   :  { %471 = vrot.lane.b32.xlu0 %v2557_v7, %s2741_s24 }
 0x7fb   :  { %v472_v8 = vpop.permute.xlu0 %471 }
 0x7fc   :  { %v2907_v9 = vmul.f32 %v2555_v61, %v472_v8 }
 0x7fe   :  { %v481_v11 = vrot.slane %v2907_v9, 4 }
 0x800   :  { %482 = vrot.lane.b32.xlu1 %v481_v11, %s2742_s3 }
 0x872   :  { %v483_v12 = vpop.permute.xlu1 %482 }
 0x873   :  { %2258 = vmatmul.mubr.msk.f32.vlgmr.msra.gmra.mrb[4].mxu0 %vm155_vm3, %v483_v12 }
 0x874   :  { %2446 = vmatpush3.bf16.msra.mxu0 %v2834_v5  ;;  %2279 = vmatprep.mubr.msk.f32.mxu0 %vm2739_vm0, %v2740_v1 }
 0x875   :  { %2447 = vmatprep.subr.bf16.mxu0 %v2738_v0 }
 0x878   :  { %2449 = vmatpush3.bf16.msra.mxu0 %v2849_v10 }
 0x879   :  { %2456 = vmatprep.subr.bf16.mxu0 %v2738_v0 }
 0x946   :  { %v552_v14 = vpop.f32.mrb[4].mxu0 }
 0x947   :  { %v557_v16 = vrot.slane %v552_v14, 2  ;;  %v2259_v17 = vpop.f32.mrb[5].mxu0 }
 0x949   :  { %v559_v18 = vadd.f32 %v557_v16, %v2873_v15 }
 0x94b   :  { %2558 = vtanh.f32 %v559_v18  ;;  %v2088_v20 = vmul.f32 -1.442695, %v559_v18 }
 0x94d   :  { %2560 = vpow2.f32 %v2088_v20 }
 0x955   :  { %v2559_v19 = vpop.eup %2558 }
 0x956   :  { %572 = vrot.lane.b32.xlu0 %v2559_v19, %s2741_s24 }
 0x957   :  { %v2561_v21 = vpop.eup %2560 }
 0x958   :  { %v563_v22 = vadd.f32 1.0, %v2561_v21 }
 0x95a   :  { %2562 = vrcp.f32 %v563_v22 }
 0x964   :  { %v2563_v23 = vpop.eup %2562 }
 0x965   :  { %v570_v27 = vmul.f32 %v2563_v23, %v568_v26 }
 0x9c8   :  { %v573_v24 = vpop.permute.xlu0 %572 }
 0x9c9   :  { %v575_v25 = vmul.f32 %v2563_v23, %v573_v24 }
 0x9cb   :  { %577 = vrot.lane.b32.xlu1 %v575_v25, %s2742_s3 }
 0xa3d   :  { %v578_v28 = vpop.permute.xlu1 %577 }
 0xa3e   :  { %v580_v29 = vadd.f32 %v578_v28, %v570_v27 }
 0xa40   :  { %2564 = vtanh.f32 %v580_v29  ;;  %v677_v44 = vrot.slane %v580_v29, 6 }
 0xa4a   :  { %v2565_v15 = vpop.eup %2564 }
 0xa4b   :  { %583 = vrot.lane.b32.xlu0 %v2565_v15, %s2741_s24 }
 0xabd   :  { %v584_v30 = vpop.permute.xlu0 %583 }
 0xabe   :  { %v2922_v31 = vmul.f32 %v2563_v23, %v584_v30 }
 0xac0   :  { %v593_v32 = vrot.slane %v2922_v31, 6 }
 0xac2   :  { %594 = vrot.lane.b32.xlu1 %v593_v32, %s2742_s3 }
 0xb34   :  { %v595_v33 = vpop.permute.xlu1 %594 }
 0xb35   :  { %2269 = vmatmul.mubr.msk.f32.vlgmr.msra.gmra.mrb[4].mxu1 %vm155_vm3, %v595_v33 }
 0xb36   :  { %2452 = vmatpush3.bf16.msra.mxu1 %v2834_v5  ;;  %2290 = vmatprep.mubr.msk.f32.mxu1 %vm2739_vm0, %v2740_v1 }
 0xb37   :  { %2453 = vmatprep.subr.bf16.mxu1 %v2738_v0 }
 0xb3a   :  { %2455 = vmatpush3.bf16.msra.mxu1 %v2849_v10 }
 0xc08   :  { %v664_v34 = vpop.f32.mrb[4].mxu1 }
 0xc09   :  { %v668_v35 = vadd.f32 %v664_v34, %v2871_v13  ;;  %v2270_v36 = vpop.f32.mrb[5].mxu1 }
 0xc0b   :  { %2566 = vtanh.f32 %v668_v35  ;;  %v2090_v38 = vmul.f32 -1.442695, %v668_v35 }
 0xc0d   :  { %2568 = vpow2.f32 %v2090_v38 }
 0xc15   :  { %v2567_v37 = vpop.eup %2566 }
 0xc16   :  { %681 = vrot.lane.b32.xlu0 %v2567_v37, %s2741_s24 }
 0xc17   :  { %v2569_v39 = vpop.eup %2568 }
 0xc18   :  { %v672_v40 = vadd.f32 1.0, %v2569_v39 }
 0xc1a   :  { %2570 = vrcp.f32 %v672_v40 }
 0xc24   :  { %v2571_v41 = vpop.eup %2570 }
 0xc25   :  { %v679_v45 = vmul.f32 %v2571_v41, %v677_v44 }
 0xc88   :  { %v682_v42 = vpop.permute.xlu0 %681 }
 0xc89   :  { %v684_v43 = vmul.f32 %v2571_v41, %v682_v42 }
 0xc8b   :  { %686 = vrot.lane.b32.xlu1 %v684_v43, %s2742_s3 }
 0xcfd   :  { %v687_v46 = vpop.permute.xlu1 %686 }
 0xcfe   :  { %v689_v47 = vadd.f32 %v687_v46, %v679_v45 }
 0xd00   :  { %2572 = vtanh.f32 %v689_v47 }
 0xd0a   :  { %v2573_v48 = vpop.eup %2572 }
 0xd0b   :  { %692 = vrot.lane.b32.xlu0 %v2573_v48, %s2741_s24 }
 0xd7d   :  { %v693_v49 = vpop.permute.xlu0 %692 }
 0xd7e   :  { %v695_v51 = vmul.f32 %v2571_v41, %v693_v49 }
 0xd80   :  { %697 = vrot.lane.b32.xlu1 %v695_v51, %s2742_s3 }
 0xdf2   :  { %v698_v52 = vpop.permute.xlu1 %697 }
 0xdf3   :  { %700 = vst.msk [vmem:[#allocation2 + $0x8] sm:$0x3] %vm258_vm2, %v698_v52  ;;  %2280 = vmatmul.mubr.msk.f32.vlgmr.msra.gmra.mrb[6].mxu0 %vm155_vm3, %v698_v52  ;;  %v1034_v52 = vld [vmem:[%s3140_s4 + $0x8] sm:$0xff] }
 0xdf4   :  { %2458 = vmatpush3.bf16.msra.mxu0 %v2834_v5  ;;  %2301 = vmatprep.mubr.msk.f32.mxu0 %vm2739_vm0, %v2740_v1 }
 0xdf5   :  { %2459 = vmatprep.subr.bf16.mxu0 %v2738_v0 }
 0xdf8   :  { %2461 = vmatpush3.bf16.msra.mxu0 %v2849_v10  ;;  %v785_v10 = vrot.slane %v689_v47, 6 }
 0xdf9   :  { %2470 = vmatprep.subr.bf16.mxu0 %v2738_v0 }
 0xec6   :  { %v769_v53 = vpop.f32.mrb[6].mxu0 }
 0xec7   :  { %v774_v54 = vrot.slane %v769_v53, 6  ;;  %v2281_v55 = vpop.f32.mrb[7].mxu0 }
 0xec8   :  { %v1126_v55 = vld [vmem:[#allocation6 + $0x8] sm:$0xff] }
 0xec9   :  { %v776_v56 = vadd.f32 %v774_v54, %v2871_v13  ;;  %v1125_v54 = vld [vmem:[#allocation6] sm:$0xff] }
 0xecb   :  { %2574 = vtanh.f32 %v776_v56  ;;  %v2092_v58 = vmul.f32 -1.442695, %v776_v56  ;;  %v1035_v56 = vld [vmem:[%s3140_s4 + $0x10] sm:$0xff] }
 0xecd   :  { %2576 = vpow2.f32 %v2092_v58  ;;  %v1127_v58 = vld [vmem:[#allocation6 + $0x10] sm:$0xff] }
 0xed5   :  { %v2575_v57 = vpop.eup %2574 }
 0xed6   :  { %789 = vrot.lane.b32.xlu0 %v2575_v57, %s2741_s24  ;;  %v1036_v57 = vld [vmem:[%s3140_s4 + $0x18] sm:$0xff] }
 0xed7   :  { %v2577_v5 = vpop.eup %2576 }
 0xed8   :  { %v780_v59 = vadd.f32 1.0, %v2577_v5  ;;  %v1128_v5 = vld [vmem:[#allocation6 + $0x18] sm:$0xff] }
 0xeda   :  { %2578 = vrcp.f32 %v780_v59  ;;  %v2466_v59 = vpack.c.bf16 %v1036_v57, %v1035_v56 }
 0xee4   :  { %v2579_v60 = vpop.eup %2578 }
 0xee5   :  { %v787_v63 = vmul.f32 %v2579_v60, %v785_v10 }
 0xf48   :  { %v790_v61 = vpop.permute.xlu0 %789 }
 0xf49   :  { %v792_v62 = vmul.f32 %v2579_v60, %v790_v61 }
 0xf4b   :  { %794 = vrot.lane.b32.xlu1 %v792_v62, %s2742_s3 }
 0xfbd   :  { %v795_v2 = vpop.permute.xlu1 %794 }
 0xfbe   :  { %v797_v3 = vadd.f32 %v795_v2, %v787_v63 }
 0xfc0   :  { %2580 = vtanh.f32 %v797_v3  ;;  %v896_v25 = vrot.slane %v797_v3, 6 }
 0xfca   :  { %v2581_v4 = vpop.eup %2580 }
 0xfcb   :  { %800 = vrot.lane.b32.xlu0 %v2581_v4, %s2741_s24 }
0x103d   :  { %v801_v6 = vpop.permute.xlu0 %800 }
0x103e   :  { %v2949_v7 = vmul.f32 %v2579_v60, %v801_v6  ;;  %v2993_v60 = vpack.c.bf16 %v1128_v5, %v1127_v58 }
0x1040   :  { %v809_v8 = vrot.slane %v2949_v7, 2 }
0x1042   :  { %810 = vrot.lane.b32.xlu1 %v809_v8, %s2742_s3  ;;  %v2097_v8 = vld [vmem:[%s3142_s6] ss:$0 sm:$0xff] }
0x10b4   :  { %v811_v11 = vpop.permute.xlu1 %810 }
0x10b5   :  { %2291 = vmatmul.mubr.msk.f32.vlgmr.msra.gmra.mrb[6].mxu1 %vm155_vm3, %v811_v11 }
0x1188   :  { %v880_v12 = vpop.f32.mrb[6].mxu1 }
0x1189   :  { %v885_v14 = vrot.slane %v880_v12, 4  ;;  %v2292_v16 = vpop.f32.mrb[7].mxu1 }
0x118b   :  { %v887_v17 = vadd.f32 %v885_v14, %v2871_v13 }
0x118d   :  { %2582 = vtanh.f32 %v887_v17  ;;  %v2094_v19 = vmul.f32 -1.442695, %v887_v17 }
0x118f   :  { %2584 = vpow2.f32 %v2094_v19 }
0x1197   :  { %v2583_v18 = vpop.eup %2582 }
0x1198   :  { %900 = vrot.lane.b32.xlu0 %v2583_v18, %s2741_s24 }
0x1199   :  { %v2585_v20 = vpop.eup %2584 }
0x119a   :  { %v891_v21 = vadd.f32 1.0, %v2585_v20 }
0x119c   :  { %2586 = vrcp.f32 %v891_v21 }
0x11a6   :  { %v2587_v22 = vpop.eup %2586 }
0x11a7   :  { %v898_v26 = vmul.f32 %v2587_v22, %v896_v25 }
0x120a   :  { %v901_v23 = vpop.permute.xlu0 %900 }
0x120b   :  { %v903_v24 = vmul.f32 %v2587_v22, %v901_v23 }
0x120d   :  { %905 = vrot.lane.b32.xlu1 %v903_v24, %s2742_s3 }
0x127f   :  { %v906_v27 = vpop.permute.xlu1 %905 }
0x1280   :  { %v908_v28 = vadd.f32 %v906_v27, %v898_v26 }
0x1282   :  { %2588 = vtanh.f32 %v908_v28 }
0x128c   :  { %v2589_v29 = vpop.eup %2588 }
0x128d   :  { %911 = vrot.lane.b32.xlu0 %v2589_v29, %s2741_s24 }
0x12ff   :  { %v912_v15 = vpop.permute.xlu0 %911 }
0x1300   :  { %v914_v30 = vmul.f32 %v2587_v22, %v912_v15 }
0x1302   :  { %v920_v32 = vrot.slane %v914_v30, 4 }
0x1304   :  { %921 = vrot.lane.b32.xlu1 %v920_v32, %s2742_s3 }
0x1376   :  { %v922_v33 = vpop.permute.xlu1 %921 }
0x1377   :  { %2302 = vmatmul.mubr.msk.f32.vlgmr.msra.gmra.mrb[8].mxu0 %vm155_vm3, %v922_v33 }
0x1378   :  { %2323 = vmatprep.mubr.msk.f32.mxu0 %vm2739_vm0, %v2740_v1 }
0x144a   :  { %v991_v34 = vpop.f32.mrb[8].mxu0 }
0x144b   :  { %v996_v35 = vrot.slane %v991_v34, 2  ;;  %v2303_v36 = vpop.f32.mrb[9].mxu0 }
0x144d   :  { %v998_v37 = vadd.f32 %v996_v35, %v2871_v13  ;;  %v1007_v13 = vrot.slane %v908_v28, 6 }
0x144f   :  { %2590 = vtanh.f32 %v998_v37  ;;  %v2096_v39 = vmul.f32 -1.442695, %v998_v37 }
0x1451   :  { %2592 = vpow2.f32 %v2096_v39 }
0x1459   :  { %v2591_v38 = vpop.eup %2590 }
0x145a   :  { %1011 = vrot.lane.b32.xlu0 %v2591_v38, %s2741_s24 }
0x145b   :  { %v2593_v40 = vpop.eup %2592 }
0x145c   :  { %v1002_v41 = vadd.f32 1.0, %v2593_v40 }
0x145e   :  { %2594 = vrcp.f32 %v1002_v41 }
0x1468   :  { %v2595_v42 = vpop.eup %2594 }
0x1469   :  { %v1009_v45 = vmul.f32 %v2595_v42, %v1007_v13 }
0x14cc   :  { %v1012_v43 = vpop.permute.xlu0 %1011 }
0x14cd   :  { %v1014_v44 = vmul.f32 %v2595_v42, %v1012_v43 }
0x14cf   :  { %1016 = vrot.lane.b32.xlu1 %v1014_v44, %s2742_s3 }
0x14d3   :  { %364 = vrot.lane.b32.xlu1 %v2892_v50, %s2742_s3 }
0x14d7   :  { %588 = vrot.lane.b32.xlu1 %v2922_v31, %s2742_s3  ;;  %v1033_v31 = vld [vmem:[%s3140_s4] sm:$0xff] }
0x14d8   :  { %v2462_v53 = vpack.c.bf16 %v1034_v52, %v1033_v31 }
0x14da   :  { %2463 = vmatprep.subr.bf16.mxu1 %v2462_v53 }
0x14db   :  { %916 = vrot.lane.b32.xlu1 %v914_v30, %s2742_s3  ;;  %2465 = vmatpush3.bf16.msra.mxu1 %v2462_v53 }
0x14dc   :  { %2467 = vmatprep.subr.bf16.mxu1 %v2466_v59 }
0x14df   :  { %2469 = vmatpush3.bf16.msra.mxu1 %v2466_v59 }
0x14e0   :  { %2476 = vmatprep.subr.bf16.mxu1 %v2738_v0 }
0x1541   :  { %v1017_v46 = vpop.permute.xlu1 %1016 }
0x1542   :  { %v1019_v47 = vadd.f32 %v1017_v46, %v1009_v45 }
0x1544   :  { %2596 = vtanh.f32 %v1019_v47 }
0x1545   :  { %v365_v48 = vpop.permute.xlu1 %364 }
0x1546   :  { %368 = vst.msk [vmem:[#allocation2] sm:$0xc] %vm367_vm4, %v365_v48 }
0x1549   :  { %v589_v49 = vpop.permute.xlu1 %588 }
0x154a   :  { %592 = vst.msk [vmem:[#allocation2] sm:$0xc0] %vm591_vm5, %v589_v49 }
0x154d   :  { %v917_v50 = vpop.permute.xlu1 %916 }
0x154e   :  { %v2597_v51 = vpop.eup %2596  ;;  %919 = vst.msk [vmem:[#allocation2 + $0x8] sm:$0x30] %vm479_vm6, %v917_v50 }
0x154f   :  { %1022 = vrot.lane.b32.xlu0 %v2597_v51, %s2741_s24 }
0x1553   :  { %476 = vrot.lane.b32.xlu0 %v2907_v9, %s2742_s3  ;;  %v2987_v9 = vpack.c.bf16 %v1126_v55, %v1125_v54 }
0x1555   :  { %2472 = vmatpush3.bf16.msra.mxu0 %v2987_v9 }
0x1556   :  { %2473 = vmatprep.subr.bf16.mxu0 %v2738_v0 }
0x1557   :  { %805 = vrot.lane.b32.xlu0 %v2949_v7, %s2742_s3 }
0x1559   :  { %2475 = vmatpush3.bf16.msra.mxu0 %v2993_v60 }
0x155a   :  { %2482 = vmatprep.subr.bf16.mxu0 %v2738_v0 }
0x155c   :  { %2324 = vmatmul.mubr.f32.vlgmr.msra.gmra.mrb[10].mxu0 %v2740_v1 }
0x155d   :  { %2484 = vmatpush3.bf16.msra.mxu0 %v2987_v9  ;;  %2345 = vmatprep.mubr.msk.f32.mxu0 %vm2739_vm0, %v2740_v1 }
0x155e   :  { %2485 = vmatprep.subr.bf16.mxu0 %v2738_v0 }
0x1561   :  { %2487 = vmatpush3.bf16.msra.mxu0 %v2993_v60 }
0x1562   :  { %2494 = vmatprep.subr.bf16.mxu0 %v2738_v0 }
0x15c1   :  { %v1023_v61 = vpop.permute.xlu0 %1022 }
0x15c2   :  { %v3000_v62 = vmul.f32 %v2595_v42, %v1023_v61 }
0x15c4   :  { %1027 = vrot.lane.b32.xlu0 %v3000_v62, %s2742_s3 }
0x15c5   :  { %v477_v10 = vpop.permute.xlu0 %476 }
0x15c6   :  { %480 = vst.msk [vmem:[#allocation2] sm:$0x30] %vm479_vm6, %v477_v10 }
0x15c9   :  { %v806_v63 = vpop.permute.xlu0 %805 }
0x15ca   :  { %808 = vst.msk [vmem:[#allocation2 + $0x8] sm:$0xc] %vm367_vm4, %v806_v63 }
0x15cd   :  { %v1031_v2 = vld [vmem:[#allocation2] sm:$0xff] }
0x15ce   :  { %2312 = vmatprep.mubr.msk.f32.mxu1 %vm155_vm3, %v1031_v2 }
0x162f   :  { %v1195_v6 = vpop.f32.mrb[10].mxu0 }
0x1630   :  { %v2325_v7 = vpop.f32.mrb[11].mxu0 }
0x1636   :  { %v1028_v3 = vpop.permute.xlu0 %1027 }
0x1637   :  { %1030 = vst.msk [vmem:[#allocation2 + $0x8] sm:$0xc0] %vm591_vm5, %v1028_v3 }
0x163e   :  { %v1032_v4 = vld [vmem:[#allocation2 + $0x8] sm:$0xff] }
0x163f   :  { %2313 = vmatmul.mubr.msk.f32.vlgmr.msra.gmra.mrb[8].mxu1 %vm155_vm3, %v1032_v4 }
0x1640   :  { %2478 = vmatpush3.bf16.msra.mxu1 %v2987_v9  ;;  %2334 = vmatprep.mubr.msk.f32.mxu1 %vm2739_vm0, %v2740_v1 }
0x1641   :  { %2479 = vmatprep.subr.bf16.mxu1 %v2738_v0 }
0x1644   :  { %2481 = vmatpush3.bf16.msra.mxu1 %v2993_v60 }
0x1645   :  { %2488 = vmatprep.subr.bf16.mxu1 %v2738_v0 }
0x1712   :  { %v2314_v11 = vpop.f32.mrb[8].mxu1 }
0x1713   :  { %v3024_v12 = vadd.f32 %v2314_v11, %v2097_v8  ;;  %v1116_v14 = vpop.f32.mrb[9].mxu1 }
0x1714   :  { %v3026_v16 = vadd.f32 %v2097_v8, %v1116_v14 }
0x1716   :  { %v1199_v17 = vadd.f32 %v1195_v6, %v3026_v16 }
0x1718   :  { %2598 = vtanh.f32 %v1199_v17  ;;  %v2100_v19 = vmul.f32 -1.442695, %v1199_v17 }
0x171a   :  { %2600 = vpow2.f32 %v2100_v19 }
0x1722   :  { %v2599_v18 = vpop.eup %2598 }
0x1723   :  { %1209 = vrot.lane.b32.xlu1 %v2599_v18, %s2741_s24 }
0x1724   :  { %v2601_v20 = vpop.eup %2600 }
0x1725   :  { %v1203_v21 = vadd.f32 1.0, %v2601_v20 }
0x1727   :  { %2602 = vrcp.f32 %v1203_v21 }
0x1731   :  { %v2603_v22 = vpop.eup %2602 }
0x1732   :  { %v1207_v25 = vmul.f32 0.0, %v2603_v22 }
0x1795   :  { %v1210_v23 = vpop.permute.xlu1 %1209 }
0x1796   :  { %v1212_v24 = vmul.f32 %v2603_v22, %v1210_v23 }
0x1798   :  { %1214 = vrot.lane.b32.xlu0 %v1212_v24, %s2742_s3 }
0x180a   :  { %v1215_v26 = vpop.permute.xlu0 %1214 }
0x180b   :  { %v1217_v27 = vadd.f32 %v1215_v26, %v1207_v25 }
0x180d   :  { %2604 = vtanh.f32 %v1217_v27  ;;  %v1311_v43 = vrot.slane %v1217_v27, 6 }
0x1817   :  { %v2605_v28 = vpop.eup %2604 }
0x1818   :  { %1220 = vrot.lane.b32.xlu1 %v2605_v28, %s2741_s24 }
0x188a   :  { %v1221_v29 = vpop.permute.xlu1 %1220 }
0x188b   :  { %v1223_v15 = vmul.f32 %v2603_v22, %v1221_v29 }
0x188d   :  { %1225 = vrot.lane.b32.xlu0 %v1223_v15, %s2742_s3 }
0x18ff   :  { %v1226_v30 = vpop.permute.xlu0 %1225 }
0x1900   :  { %2335 = vmatmul.mubr.msk.f32.vlgmr.msra.gmra.mrb[10].mxu1 %vm155_vm3, %v1226_v30 }
0x1901   :  { %2490 = vmatpush3.bf16.msra.mxu1 %v2987_v9  ;;  %2356 = vmatprep.mubr.msk.f32.mxu1 %vm2739_vm0, %v2740_v1 }
0x1902   :  { %2491 = vmatprep.subr.bf16.mxu1 %v2738_v0 }
0x1905   :  { %2493 = vmatpush3.bf16.msra.mxu1 %v2993_v60 }
0x1906   :  { %2500 = vmatprep.subr.bf16.mxu1 %v2738_v0 }
0x19d3   :  { %v1295_v32 = vpop.f32.mrb[10].mxu1 }
0x19d4   :  { %v1300_v33 = vrot.slane %v1295_v32, 6  ;;  %v2336_v34 = vpop.f32.mrb[11].mxu1 }
0x19d6   :  { %v1302_v35 = vadd.f32 %v1300_v33, %v3026_v16 }
0x19d8   :  { %2606 = vtanh.f32 %v1302_v35  ;;  %v2102_v37 = vmul.f32 -1.442695, %v1302_v35 }
0x19da   :  { %2608 = vpow2.f32 %v2102_v37 }
0x19e2   :  { %v2607_v36 = vpop.eup %2606 }
0x19e3   :  { %1315 = vrot.lane.b32.xlu1 %v2607_v36, %s2741_s24 }
0x19e4   :  { %v2609_v38 = vpop.eup %2608 }
0x19e5   :  { %v1306_v39 = vadd.f32 1.0, %v2609_v38 }
0x19e7   :  { %2610 = vrcp.f32 %v1306_v39 }
0x19f1   :  { %v2611_v40 = vpop.eup %2610 }
0x19f2   :  { %v1313_v44 = vmul.f32 %v2611_v40, %v1311_v43 }
0x1a55   :  { %v1316_v41 = vpop.permute.xlu1 %1315 }
0x1a56   :  { %v1318_v42 = vmul.f32 %v2611_v40, %v1316_v41 }
0x1a58   :  { %1320 = vrot.lane.b32.xlu0 %v1318_v42, %s2742_s3 }
0x1aca   :  { %v1321_v13 = vpop.permute.xlu0 %1320 }
0x1acb   :  { %v1323_v45 = vadd.f32 %v1321_v13, %v1313_v44 }
0x1acd   :  { %2612 = vtanh.f32 %v1323_v45  ;;  %v1418_v61 = vrot.slane %v1323_v45, 6 }
0x1ad7   :  { %v2613_v46 = vpop.eup %2612 }
0x1ad8   :  { %1326 = vrot.lane.b32.xlu1 %v2613_v46, %s2741_s24 }
0x1b4a   :  { %v1327_v47 = vpop.permute.xlu1 %1326 }
0x1b4b   :  { %v1329_v48 = vmul.f32 %v2611_v40, %v1327_v47 }
0x1b4d   :  { %v1331_v49 = vrot.slane %v1329_v48, 2 }
0x1b4f   :  { %1332 = vrot.lane.b32.xlu0 %v1331_v49, %s2742_s3 }
0x1bc1   :  { %v1333_v50 = vpop.permute.xlu0 %1332 }
0x1bc2   :  { %2346 = vmatmul.mubr.msk.f32.vlgmr.msra.gmra.mrb[12].mxu0 %vm155_vm3, %v1333_v50 }
0x1bc3   :  { %2496 = vmatpush3.bf16.msra.mxu0 %v2987_v9  ;;  %2367 = vmatprep.mubr.msk.f32.mxu0 %vm2739_vm0, %v2740_v1 }
0x1bc4   :  { %2497 = vmatprep.subr.bf16.mxu0 %v2738_v0 }
0x1bc7   :  { %2499 = vmatpush3.bf16.msra.mxu0 %v2993_v60 }
0x1bc8   :  { %2506 = vmatprep.subr.bf16.mxu0 %v2738_v0 }
0x1c95   :  { %v1402_v51 = vpop.f32.mrb[12].mxu0 }
0x1c96   :  { %v1407_v31 = vrot.slane %v1402_v51, 4  ;;  %v2347_v52 = vpop.f32.mrb[13].mxu0 }
0x1c98   :  { %v1409_v53 = vadd.f32 %v1407_v31, %v3026_v16 }
0x1c9a   :  { %2614 = vtanh.f32 %v1409_v53  ;;  %v2104_v55 = vmul.f32 -1.442695, %v1409_v53 }
0x1c9c   :  { %2616 = vpow2.f32 %v2104_v55 }
0x1ca4   :  { %v2615_v54 = vpop.eup %2614 }
0x1ca5   :  { %1422 = vrot.lane.b32.xlu1 %v2615_v54, %s2741_s24 }
0x1ca6   :  { %v2617_v56 = vpop.eup %2616 }
0x1ca7   :  { %v1413_v57 = vadd.f32 1.0, %v2617_v56 }
0x1ca9   :  { %2618 = vrcp.f32 %v1413_v57 }
0x1cb3   :  { %v2619_v58 = vpop.eup %2618 }
0x1cb4   :  { %v1420_v10 = vmul.f32 %v2619_v58, %v1418_v61 }
0x1d17   :  { %v1423_v5 = vpop.permute.xlu1 %1422 }
0x1d18   :  { %v1425_v59 = vmul.f32 %v2619_v58, %v1423_v5 }
0x1d1a   :  { %1427 = vrot.lane.b32.xlu0 %v1425_v59, %s2742_s3 }
0x1d8c   :  { %v1428_v63 = vpop.permute.xlu0 %1427 }
0x1d8d   :  { %v1430_v2 = vadd.f32 %v1428_v63, %v1420_v10 }
0x1d8f   :  { %2620 = vtanh.f32 %v1430_v2  ;;  %v1525_v26 = vrot.slane %v1430_v2, 6 }
0x1d99   :  { %v2621_v3 = vpop.eup %2620 }
0x1d9a   :  { %1433 = vrot.lane.b32.xlu1 %v2621_v3, %s2741_s24 }
0x1e0c   :  { %v1434_v4 = vpop.permute.xlu1 %1433 }
0x1e0d   :  { %v1436_v6 = vmul.f32 %v2619_v58, %v1434_v4 }
0x1e0f   :  { %v1438_v7 = vrot.slane %v1436_v6, 4 }
0x1e11   :  { %1439 = vrot.lane.b32.xlu0 %v1438_v7, %s2742_s3 }
0x1e83   :  { %v1440_v8 = vpop.permute.xlu0 %1439 }
0x1e84   :  { %2357 = vmatmul.mubr.msk.f32.vlgmr.msra.gmra.mrb[12].mxu1 %vm155_vm3, %v1440_v8 }
0x1e85   :  { %2502 = vmatpush3.bf16.msra.mxu1 %v2987_v9  ;;  %2378 = vmatprep.mubr.msk.f32.mxu1 %vm2739_vm0, %v2740_v1 }
0x1e86   :  { %2503 = vmatprep.subr.bf16.mxu1 %v2738_v0 }
0x1e89   :  { %2505 = vmatpush3.bf16.msra.mxu1 %v2993_v60 }
0x1e8a   :  { %2512 = vmatprep.subr.bf16.mxu1 %v2738_v0 }
0x1f57   :  { %v1509_v11 = vpop.f32.mrb[12].mxu1 }
0x1f58   :  { %v1514_v14 = vrot.slane %v1509_v11, 2  ;;  %v2358_v17 = vpop.f32.mrb[13].mxu1 }
0x1f5a   :  { %v1516_v18 = vadd.f32 %v1514_v14, %v3026_v16 }
0x1f5c   :  { %2622 = vtanh.f32 %v1516_v18  ;;  %v2106_v20 = vmul.f32 -1.442695, %v1516_v18 }
0x1f5e   :  { %2624 = vpow2.f32 %v2106_v20 }
0x1f66   :  { %v2623_v19 = vpop.eup %2622 }
0x1f67   :  { %1529 = vrot.lane.b32.xlu1 %v2623_v19, %s2741_s24 }
0x1f68   :  { %v2625_v21 = vpop.eup %2624 }
0x1f69   :  { %v1520_v22 = vadd.f32 1.0, %v2625_v21 }
0x1f6b   :  { %2626 = vrcp.f32 %v1520_v22 }
0x1f75   :  { %v2627_v23 = vpop.eup %2626 }
0x1f76   :  { %v1527_v27 = vmul.f32 %v2627_v23, %v1525_v26 }
0x1fd9   :  { %v1530_v24 = vpop.permute.xlu1 %1529 }
0x1fda   :  { %v1532_v25 = vmul.f32 %v2627_v23, %v1530_v24 }
0x1fdc   :  { %1534 = vrot.lane.b32.xlu0 %v1532_v25, %s2742_s3 }
0x204e   :  { %v1535_v28 = vpop.permute.xlu0 %1534 }
0x204f   :  { %v1537_v29 = vadd.f32 %v1535_v28, %v1527_v27 }
0x2051   :  { %2628 = vtanh.f32 %v1537_v29  ;;  %v1629_v44 = vrot.slane %v1537_v29, 6 }
0x205b   :  { %v2629_v16 = vpop.eup %2628 }
0x205c   :  { %1540 = vrot.lane.b32.xlu1 %v2629_v16, %s2741_s24 }
0x20ce   :  { %v1541_v15 = vpop.permute.xlu1 %1540 }
0x20cf   :  { %v1543_v30 = vmul.f32 %v2627_v23, %v1541_v15 }
0x20d1   :  { %v1545_v32 = vrot.slane %v1543_v30, 6 }
0x20d3   :  { %1546 = vrot.lane.b32.xlu0 %v1545_v32, %s2742_s3 }
0x2145   :  { %v1547_v33 = vpop.permute.xlu0 %1546 }
0x2146   :  { %2368 = vmatmul.mubr.msk.f32.vlgmr.msra.gmra.mrb[14].mxu0 %vm155_vm3, %v1547_v33 }
0x2147   :  { %2508 = vmatpush3.bf16.msra.mxu0 %v2987_v9  ;;  %2389 = vmatprep.mubr.msk.f32.mxu0 %vm2739_vm0, %v2740_v1 }
0x2148   :  { %2509 = vmatprep.subr.bf16.mxu0 %v2738_v0 }
0x214b   :  { %2511 = vmatpush3.bf16.msra.mxu0 %v2993_v60 }
0x214c   :  { %2518 = vmatprep.subr.bf16.mxu0 %v2738_v0 }
0x2219   :  { %v1616_v34 = vpop.f32.mrb[14].mxu0 }
0x221a   :  { %v1620_v35 = vadd.f32 %v1616_v34, %v3024_v12  ;;  %v2369_v36 = vpop.f32.mrb[15].mxu0 }
0x221c   :  { %2630 = vtanh.f32 %v1620_v35  ;;  %v2108_v38 = vmul.f32 -1.442695, %v1620_v35 }
0x221e   :  { %2632 = vpow2.f32 %v2108_v38 }
0x2226   :  { %v2631_v37 = vpop.eup %2630 }
0x2227   :  { %1633 = vrot.lane.b32.xlu1 %v2631_v37, %s2741_s24 }
0x2228   :  { %v2633_v39 = vpop.eup %2632 }
0x2229   :  { %v1624_v40 = vadd.f32 1.0, %v2633_v39 }
0x222b   :  { %2634 = vrcp.f32 %v1624_v40 }
0x2235   :  { %v2635_v41 = vpop.eup %2634 }
0x2236   :  { %v1631_v13 = vmul.f32 %v2635_v41, %v1629_v44 }
0x2299   :  { %v1634_v42 = vpop.permute.xlu1 %1633 }
0x229a   :  { %v1636_v43 = vmul.f32 %v2635_v41, %v1634_v42 }
0x229c   :  { %1638 = vrot.lane.b32.xlu0 %v1636_v43, %s2742_s3 }
0x230e   :  { %v1639_v45 = vpop.permute.xlu0 %1638 }
0x230f   :  { %v1641_v46 = vadd.f32 %v1639_v45, %v1631_v13  ;;  %v1976_v45 = vld [vmem:[%s3143_s7 + $0x8] sm:$0xff] }
0x2311   :  { %2636 = vtanh.f32 %v1641_v46 }
0x231b   :  { %v2637_v47 = vpop.eup %2636 }
0x231c   :  { %1644 = vrot.lane.b32.xlu1 %v2637_v47, %s2741_s24 }
0x238e   :  { %v1645_v48 = vpop.permute.xlu1 %1644 }
0x238f   :  { %v1647_v49 = vmul.f32 %v2635_v41, %v1645_v48  ;;  %v1978_v48 = vld [vmem:[%s3143_s7 + $0x18] sm:$0xff] }
0x2391   :  { %1649 = vrot.lane.b32.xlu0 %v1647_v49, %s2742_s3 }
0x2403   :  { %v1650_v50 = vpop.permute.xlu0 %1649 }
0x2404   :  { %2379 = vmatmul.mubr.msk.f32.vlgmr.msra.gmra.mrb[14].mxu1 %vm155_vm3, %v1650_v50 }
0x2405   :  { %2514 = vmatpush3.bf16.msra.mxu1 %v2987_v9  ;;  %2400 = vmatprep.mubr.msk.f32.mxu1 %vm2739_vm0, %v2740_v1 }
0x2406   :  { %2515 = vmatprep.subr.bf16.mxu1 %v2738_v0 }
0x2409   :  { %2517 = vmatpush3.bf16.msra.mxu1 %v2993_v60  ;;  %v1735_v60 = vrot.slane %v1641_v46, 6  ;;  %v1977_v46 = vld [vmem:[%s3143_s7 + $0x10] sm:$0xff] }
0x240a   :  { %v2522_v49 = vpack.c.bf16 %v1978_v48, %v1977_v46 }
0x24d7   :  { %v1719_v51 = vpop.f32.mrb[14].mxu1 }
0x24d8   :  { %v1724_v31 = vrot.slane %v1719_v51, 6  ;;  %v2380_v52 = vpop.f32.mrb[15].mxu1 }
0x24d9   :  { %v1968_v52 = vrot.slane %v3000_v62, 6 }
0x24da   :  { %v1726_v53 = vadd.f32 %v1724_v31, %v3024_v12 }
0x24dc   :  { %2638 = vtanh.f32 %v1726_v53  ;;  %v2110_v55 = vmul.f32 -1.442695, %v1726_v53 }
0x24de   :  { %2640 = vpow2.f32 %v2110_v55 }
0x24e6   :  { %v2639_v54 = vpop.eup %2638 }
0x24e7   :  { %1739 = vrot.lane.b32.xlu1 %v2639_v54, %s2741_s24 }
0x24e8   :  { %v2641_v56 = vpop.eup %2640 }
0x24e9   :  { %v1730_v9 = vadd.f32 1.0, %v2641_v56 }
0x24eb   :  { %2642 = vrcp.f32 %v1730_v9 }
0x24f5   :  { %v2643_v57 = vpop.eup %2642 }
0x24f6   :  { %v1737_v59 = vmul.f32 %v2643_v57, %v1735_v60 }
0x2559   :  { %v1740_v58 = vpop.permute.xlu1 %1739 }
0x255a   :  { %v1742_v5 = vmul.f32 %v2643_v57, %v1740_v58 }
0x255c   :  { %1744 = vrot.lane.b32.xlu0 %v1742_v5, %s2742_s3 }
0x25ce   :  { %v1745_v61 = vpop.permute.xlu0 %1744 }
0x25cf   :  { %v1747_v10 = vadd.f32 %v1745_v61, %v1737_v59 }
0x25d1   :  { %2644 = vtanh.f32 %v1747_v10 }
0x25db   :  { %v2645_v63 = vpop.eup %2644 }
0x25dc   :  { %1750 = vrot.lane.b32.xlu1 %v2645_v63, %s2741_s24 }
0x264e   :  { %v1751_v2 = vpop.permute.xlu1 %1750 }
0x264f   :  { %v1753_v3 = vmul.f32 %v2643_v57, %v1751_v2 }
0x2651   :  { %v1755_v4 = vrot.slane %v1753_v3, 2 }
0x2653   :  { %1756 = vrot.lane.b32.xlu0 %v1755_v4, %s2742_s3 }
0x26c5   :  { %v1757_v6 = vpop.permute.xlu0 %1756 }
0x26c6   :  { %2390 = vmatmul.mubr.msk.f32.vlgmr.msra.gmra.mrb[16].mxu0 %vm155_vm3, %v1757_v6 }
0x26c7   :  { %2411 = vmatprep.mubr.msk.f32.mxu0 %vm2739_vm0, %v2740_v1  ;;  %v1842_v1 = vrot.slane %v1747_v10, 6 }
0x2799   :  { %v1826_v7 = vpop.f32.mrb[16].mxu0 }
0x279a   :  { %v1831_v8 = vrot.slane %v1826_v7, 4  ;;  %v2391_v11 = vpop.f32.mrb[17].mxu0 }
0x279c   :  { %v1833_v14 = vadd.f32 %v1831_v8, %v3024_v12 }
0x279e   :  { %2646 = vtanh.f32 %v1833_v14  ;;  %v2112_v18 = vmul.f32 -1.442695, %v1833_v14 }
0x27a0   :  { %2648 = vpow2.f32 %v2112_v18 }
0x27a8   :  { %v2647_v17 = vpop.eup %2646 }
0x27a9   :  { %1846 = vrot.lane.b32.xlu1 %v2647_v17, %s2741_s24 }
0x27aa   :  { %v2649_v19 = vpop.eup %2648 }
0x27ab   :  { %v1837_v20 = vadd.f32 1.0, %v2649_v19 }
0x27ad   :  { %2650 = vrcp.f32 %v1837_v20 }
0x27b7   :  { %v2651_v21 = vpop.eup %2650 }
0x27b8   :  { %v1844_v24 = vmul.f32 %v2651_v21, %v1842_v1 }
0x281b   :  { %v1847_v22 = vpop.permute.xlu1 %1846 }
0x281c   :  { %v1849_v23 = vmul.f32 %v2651_v21, %v1847_v22 }
0x281e   :  { %1851 = vrot.lane.b32.xlu0 %v1849_v23, %s2742_s3 }
0x2890   :  { %v1852_v25 = vpop.permute.xlu0 %1851 }
0x2891   :  { %v1854_v26 = vadd.f32 %v1852_v25, %v1844_v24 }
0x2893   :  { %2652 = vtanh.f32 %v1854_v26  ;;  %v1949_v42 = vrot.slane %v1854_v26, 6 }
0x289d   :  { %v2653_v27 = vpop.eup %2652 }
0x289e   :  { %1857 = vrot.lane.b32.xlu1 %v2653_v27, %s2741_s24 }
0x2910   :  { %v1858_v28 = vpop.permute.xlu1 %1857 }
0x2911   :  { %v1860_v29 = vmul.f32 %v2651_v21, %v1858_v28 }
0x2913   :  { %v1862_v16 = vrot.slane %v1860_v29, 4 }
0x2915   :  { %1863 = vrot.lane.b32.xlu0 %v1862_v16, %s2742_s3 }
0x2987   :  { %v1864_v15 = vpop.permute.xlu0 %1863 }
0x2988   :  { %2401 = vmatmul.mubr.msk.f32.vlgmr.msra.gmra.mrb[16].mxu1 %vm155_vm3, %v1864_v15 }
0x2a5b   :  { %v1933_v30 = vpop.f32.mrb[16].mxu1 }
0x2a5c   :  { %v1938_v32 = vrot.slane %v1933_v30, 2  ;;  %v2402_v33 = vpop.f32.mrb[17].mxu1 }
0x2a5e   :  { %v1940_v34 = vadd.f32 %v1938_v32, %v3024_v12  ;;  %v1975_v12 = vld [vmem:[%s3143_s7] sm:$0xff] }
0x2a5f   :  { %v2519_v47 = vpack.c.bf16 %v1976_v45, %v1975_v12 }
0x2a60   :  { %2654 = vtanh.f32 %v1940_v34  ;;  %v2114_v36 = vmul.f32 -1.442695, %v1940_v34 }
0x2a61   :  { %2520 = vmatpush3.bf16.msra.mxu0 %v2519_v47 }
0x2a62   :  { %2656 = vpow2.f32 %v2114_v36  ;;  %2521 = vmatprep.subr.bf16.mxu0 %v2738_v0  ;;  %v2115_v0 = vld [vmem:[%s3144_s8] ss:$0 sm:$0xff] }
0x2a65   :  { %2523 = vmatpush3.bf16.msra.mxu0 %v2522_v49 }
0x2a6a   :  { %v2655_v35 = vpop.eup %2654 }
0x2a6b   :  { %1953 = vrot.lane.b32.xlu1 %v2655_v35, %s2741_s24 }
0x2a6c   :  { %v2657_v37 = vpop.eup %2656 }
0x2a6d   :  { %v1944_v38 = vadd.f32 1.0, %v2657_v37 }
0x2a6f   :  { %2658 = vrcp.f32 %v1944_v38 }
0x2a79   :  { %v2659_v39 = vpop.eup %2658 }
0x2a7a   :  { %v1951_v43 = vmul.f32 %v2659_v39, %v1949_v42 }
0x2add   :  { %v1954_v40 = vpop.permute.xlu1 %1953 }
0x2ade   :  { %v1956_v41 = vmul.f32 %v2659_v39, %v1954_v40 }
0x2ae0   :  { %1958 = vrot.lane.b32.xlu0 %v1956_v41, %s2742_s3 }
0x2b52   :  { %v1959_v44 = vpop.permute.xlu0 %1958 }
0x2b53   :  { %v1961_v13 = vadd.f32 %v1959_v44, %v1951_v43 }
0x2b55   :  { %2660 = vtanh.f32 %v1961_v13 }
0x2b5f   :  { %v2661_v50 = vpop.eup %2660 }
0x2b60   :  { %1964 = vrot.lane.b32.xlu1 %v2661_v50, %s2741_s24 }
0x2bd2   :  { %v1965_v51 = vpop.permute.xlu1 %1964 }
0x2bd3   :  { %v1967_v31 = vmul.f32 %v2659_v39, %v1965_v51 }
0x2bd5   :  { %v1971_v53 = vrot.slane %v1967_v31, 4 }
0x2bd7   :  { %v1974_v54 = vsel %vm1973_vm7, %v1968_v52, %v1971_v53 }
0x2bd8   :  { %1987 = vrot.lane.b32.xlu0 %v1974_v54, %s2742_s3 }
0x2c4a   :  { %v1988_v55 = vpop.permute.xlu0 %1987 }
0x2c4b   :  { %2412 = vmatmul.mubr.msk.f32.vlgmr.msra.gmra.mrb[18].mxu0 %vm155_vm3, %v1988_v55 }
0x2d1e   :  { %v2057_v56 = vpop.f32.mrb[18].mxu0 }
0x2d1f   :  { %v2058_v9 = vadd.f32 %v2115_v0, %v2057_v56  ;;  %v2413_v57 = vpop.f32.mrb[19].mxu0 }
0x2d21   :  { %2062 = vst.msk [vmem:[#allocation8] sm:$0xf] %vm2061_vm8, %v2058_v9 }
0x2d22   :  { %2717 = shalt.err (!%p2714_p6)
}
0x2d23   :  { %s2718_s0 = scalar_lea.hbm %s3145_s9, 64 }
0x2d24   :  { %p2719_p7 = scmp.ne.s32.totalorder %s3145_s9, %s2718_s0  ;;  %p2722_p8 = scmp.lt.u32.totalorder %s2718_s0, %s3145_s9 }
0x2d26   :  { %p2724_p9 = pnand %p2722_p8, %p2719_p7 }
0x2d28   :  { %2727 = shalt.err (!%p2724_p9)
}
0x2d29   :  { %2072 = dma.vmem_to_hbm [thread:$0]  %s2070_s20, 64, %s3145_s9, [#allocation5]  }
0x2d2a   :  { %2732 = dma.done.wait [#allocation5], 64  }
0x2d2b   :  { %2733 = vsyncadd [#allocation5], 4294967232 }
0x2d2c   :  { %2076 = vsyncpa [#allocation4], 1 }
0x2d2d   :  { %2077 = vsyncpa [#allocation7], 1 }
0x2d2e   :  { %2078 = vsyncpa [#allocation5], 1 }

</bundles_post_ra>
